<compile_context>
chip_gen: v5e
topology: v5e:2x2
jax: 0.10.0
libtpu: 0.0.40
codegen_flags: <defaults>
</compile_context>

<pallas_src>
import functools

import jax
import jax.numpy as jnp
from jax.experimental import pallas as pl
from jax.experimental.pallas import tpu as pltpu


# ----------------------------------------------------------------------------
# Kernel
# ----------------------------------------------------------------------------
def _vq_kernel(x_ref, e_ref, et_ref, he2_ref, q_ref, sse_ref,
               *, hw, bb, mask_tail, dist_dtype):
    """One grid step quantizes a (bb, D, T) channel-major slab.

    x_ref   : (bb, D, T)  NCHW input slab — D channels on sublanes, T spatial cols on lanes
    e_ref   : (K, D)      codebook, resident (constant index map, single-buffered)
    et_ref  : (D, K)      codebook transpose for the one-hot gather matmul, resident
    he2_ref : (K, 1)      0.5 * ||e_k||^2 precomputed in the wrapper, resident
    q_ref   : (bb, D, T)  quantized output slab (lane-dense store)
    sse_ref : (1, 1, 1, T) per-column sum over bb and D of (q - x)^2 (partial SSE)
    """
    e = e_ref[...]                               # (K, D) f32
    et = et_ref[...]                             # (D, K) f32
    he2 = he2_ref[...]                           # (K, 1) f32
    k = e.shape[0]
    t = x_ref.shape[2]

    # Hoisted out of the per-batch loop: int32 row ids (no float sentinel/casts).
    rows = jax.lax.broadcasted_iota(jnp.int32, (k, t), 0)        # (K, T)
    if mask_tail:
        cols = (jax.lax.broadcasted_iota(jnp.int32, (1, t), 1)
                + pl.program_id(1) * t)                          # (1, T)
        valid = cols < hw

    sse = jnp.zeros((1, t), dtype=jnp.float32)
    for i in range(bb):                          # static unroll over the folded batch block
        x = x_ref[i].astype(jnp.float32)         # (D, T)

        # argmin_k ||x_t - e_k||^2  ==  argmin_k ( 0.5*||e_k||^2 - e_k . x_t )
        # (per-column ||x||^2 dropped; ||e||^2 hoisted to the wrapper)
        scores = jnp.dot(e.astype(dist_dtype), x.astype(dist_dtype),
                         preferred_element_type=jnp.float32)     # (K, T) on MXU
        dist = he2 - scores                                      # (K, T)

        # First-occurrence argmin over the K (sublane) axis via min-reduces only.
        d_min = jnp.min(dist, axis=0, keepdims=True)             # (1, T)
        idx = jnp.min(jnp.where(dist == d_min, rows, k),
                      axis=0, keepdims=True)                     # (1, T) int32
        onehot = (rows == idx).astype(jnp.float32)               # (K, T)

        # q[:, t] = e_{idx_t} via one-hot matmul: (D, K) @ (K, T) -> (D, T) on MXU.
        q = jnp.dot(et, onehot, preferred_element_type=jnp.float32)
        q_ref[i] = q.astype(q_ref.dtype)

        diff = q - x
        dd = diff * diff
        if mask_tail:
            dd = jnp.where(valid, dd, 0.0)       # drop ragged-tail garbage columns
        sse = sse + jnp.sum(dd, axis=0, keepdims=True)

    sse_ref[...] = sse.reshape(sse_ref.shape)


# ----------------------------------------------------------------------------
# Tiling policy (explicit VMEM budget)
# ----------------------------------------------------------------------------
_VMEM_BUDGET = 32 * 1024 * 1024       # conservative across v5e / v6e / v7x
_VMEM_LIMIT_CAP = 48 * 1024 * 1024    # never ask for more than ~48 MiB scoped (v7x = 64 MiB phys)
_TARGET_STEP_BYTES = 1 * 1024 * 1024  # aim for >= ~1 MiB of x+q traffic per grid step


def _step_footprint_bytes(D, K, tile, bb, x_itemsize):
    """Per-step VMEM footprint model (bytes)."""
    resident = (2 * K * D + K) * 4                 # e, e^T, 0.5||e||^2 (single-buffered)
    slabs = 4 * bb * D * tile * x_itemsize         # double-buffered x-in + q-out slabs
    inter = (5 * K + 4 * D) * tile * 4             # live f32 (K,T)/(D,T) intermediates
    return resident + slabs + inter + 2 * tile * 4


def _choose_tiling(B, D, HW, K, x_itemsize,
                   vmem_budget_bytes=_VMEM_BUDGET,
                   target_step_bytes=_TARGET_STEP_BYTES):
    """Pick (batch_block, spatial_tile) from the VMEM budget, not a hard cap."""
    def fits(tile, bb):
        return _step_footprint_bytes(D, K, tile, bb, x_itemsize) <= vmem_budget_bytes

    # Spatial (lane) tile: the full extent if it fits, otherwise the largest
    # 128-multiple that fits (ragged tails handled by in-kernel masking).
    if fits(HW, 1):
        tile = HW
    else:
        tile = min((HW // 128) * 128, 8 * 1024)
        while tile > 128 and not fits(tile, 1):
            tile -= 128
        tile = max(tile, 128)
        tile = min(tile, HW)

    # Batch fold: smallest divisor of B whose x+q slab traffic reaches the
    # target bytes/step, bounded by what still fits in the budget.
    bb = 1
    per_b = 2 * D * tile * x_itemsize
    for cand in range(1, min(B, 8) + 1):
        if B % cand != 0 or not fits(tile, cand):
            continue
        bb = cand
        if cand * per_b >= target_step_bytes:
            break
    return bb, tile


# ----------------------------------------------------------------------------
# Wrapper
# ----------------------------------------------------------------------------
@functools.partial(
    jax.jit,
    static_argnames=("commitment_cost", "tile_hw", "batch_block",
                     "distance_in_bf16", "single_buffer_resident"))
def _vq_forward_impl(inputs_nchw, codebook, commitment_cost, tile_hw, batch_block,
                     distance_in_bf16, single_buffer_resident):
    B, C, H, W = inputs_nchw.shape
    K, D = codebook.shape
    if C != D:
        raise ValueError("channel dim must equal embedding_dim")
    HW = H * W
    x_itemsize = jnp.dtype(inputs_nchw.dtype).itemsize

    auto_bb, auto_tile = _choose_tiling(B, D, HW, K, x_itemsize)
    bb = batch_block if batch_block is not None else auto_bb
    tile = tile_hw if tile_hw is not None else auto_tile
    if B % bb != 0:
        raise ValueError("batch_block must divide the batch size")
    if tile != HW and tile % 128 != 0:
        raise ValueError("tile_hw must be a multiple of 128 lanes or the full H*W extent")

    nb = B // bb
    nt = pl.cdiv(HW, tile)
    mask_tail = (HW % tile) != 0

    vmem_limit = int(min(
        _VMEM_LIMIT_CAP,
        max(32 * 1024 * 1024,
            _step_footprint_bytes(D, K, tile, bb, x_itemsize) * 5 // 4 + (2 << 20))))

    # Pure reshape (no transpose, no extra HBM pass): (B, C, H, W) -> (B, D, H*W).
    # Input dtype is kept through the pallas_call (bf16 latents stay bf16).
    x3 = inputs_nchw.reshape(B, D, HW)

    e_f32 = codebook.astype(jnp.float32)
    e_t = jnp.transpose(e_f32)                                      # (D, K), tiny, once
    half_e2 = 0.5 * jnp.sum(e_f32 * e_f32, axis=1, keepdims=True)   # (K, 1), hoisted

    kernel = functools.partial(
        _vq_kernel, hw=HW, bb=bb, mask_tail=mask_tail,
        dist_dtype=jnp.bfloat16 if distance_in_bf16 else jnp.float32)

    def _resident(shape):
        # Constant index map -> the operand never changes across the grid;
        # single-buffer it so the VMEM goes to bigger x/q slabs instead.
        if single_buffer_resident:
            return pl.BlockSpec(shape, lambda b, j: (0,) * len(shape),
                                pipeline_mode=pl.Buffered(1))
        return pl.BlockSpec(shape, lambda b, j: (0,) * len(shape))

    q3, sse_part = pl.pallas_call(
        kernel,
        out_shape=(
            jax.ShapeDtypeStruct((B, D, HW), inputs_nchw.dtype),
            jax.ShapeDtypeStruct((nb, nt, 1, tile), jnp.float32),
        ),
        grid_spec=pltpu.PrefetchScalarGridSpec(
            num_scalar_prefetch=0,
            grid=(nb, nt),
            in_specs=[
                pl.BlockSpec((bb, D, tile), lambda b, j: (b, 0, j)),   # inputs slab
                _resident((K, D)),                                     # codebook
                _resident((D, K)),                                     # codebook^T
                _resident((K, 1)),                                     # 0.5*||e||^2
            ],
            out_specs=[
                pl.BlockSpec((bb, D, tile), lambda b, j: (b, 0, j)),        # quantized slab
                pl.BlockSpec((1, 1, 1, tile), lambda b, j: (b, j, 0, 0)),   # SSE partials
            ],
        ),
        compiler_params=pltpu.CompilerParams(
            # No cross-step carried state -> fully parallel (megacore / v7x 2-TC friendly).
            dimension_semantics=("parallel", "parallel"),
            vmem_limit_bytes=vmem_limit,
        ),
    )(x3, e_f32, e_t, half_e2)

    sse = jnp.sum(sse_part)
    mse = sse / jnp.float32(B * HW * D)
    # codebook_loss + commitment_cost * commitment_loss; both equal mse(q, x) in value.
    loss = (1.0 + jnp.float32(commitment_cost)) * mse
    return q3.reshape(B, D, H, W), loss


_SINGLE_BUFFER_RESIDENT = True  # flipped off once if pipeline_mode is rejected


def vector_quantizer_forward(inputs_nchw, codebook, commitment_cost=0.25,
                             tile_hw=None, batch_block=None, distance_in_bf16=False):
    """JAX/Pallas equivalent of VectorQuantizer.forward.

    inputs_nchw: (B, C, H, W) conv latent with C == embedding_dim.
    codebook   : (K, D) embedding weight.
    Returns (quantized_nchw, loss); quantized carries the straight-through
    forward value (the nearest codebook vector, NCHW layout, input dtype).
    """
    global _SINGLE_BUFFER_RESIDENT
    if _SINGLE_BUFFER_RESIDENT:
        try:
            return _vq_forward_impl(inputs_nchw, codebook, commitment_cost,
                                    tile_hw, batch_block, distance_in_bf16, True)
        except Exception:
            # pl.Buffered(1) on the resident operands is a VMEM-only optimization;
            # fall back to default double-buffering if this jax build rejects it.
            _SINGLE_BUFFER_RESIDENT = False
    return _vq_forward_impl(inputs_nchw, codebook, commitment_cost,
                            tile_hw, batch_block, distance_in_bf16, False)


# ----------------------------------------------------------------------------
# Pure-JAX reference (for verification)
# ----------------------------------------------------------------------------
def _reference_forward(inputs_nchw, codebook, commitment_cost):
    """Mirrors the PyTorch forward; also returns the top-2 distance gap so the
    test can ignore index flips on numerically tied codes."""
    B, C, H, W = inputs_nchw.shape
    D = codebook.shape[1]
    x = jnp.transpose(inputs_nchw, (0, 2, 3, 1)).reshape(-1, D)
    dist = (jnp.sum(x**2, axis=1, keepdims=True)
            + jnp.sum(codebook**2, axis=1)
            - 2.0 * x @ codebook.T)
    idx = jnp.argmin(dist, axis=1)
    q = codebook[idx]
    mse = jnp.mean((q - x) ** 2)
    loss = mse + commitment_cost * mse
    q_nchw = jnp.transpose(q.reshape(B, H, W, D), (0, 3, 1, 2))
    d_sorted = jnp.sort(dist, axis=1)
    gap = d_sorted[:, 1] - d_sorted[:, 0]
    return q_nchw, loss, gap


if __name__ == "__main__":
    # Module hyper-parameters (synthetic, deterministic init — no checkpoints).
    num_embeddings = 64        # K
    embedding_dim = 32         # D (== channel dim of the conv latent)
    commitment_cost = 0.25

    # Conv-latent shaped input: NCHW (B=2, C=32, H=16, W=16) -> H*W = 256 lanes.
    B, C, H, W = 2, embedding_dim, 16, 16

    key = jax.random.PRNGKey(0)
    k_x, k_e = jax.random.split(key)
    inputs = jax.random.normal(k_x, (B, C, H, W), dtype=jnp.float32)
    # nn.Embedding weight init: uniform(-1/K, 1/K)
    codebook = jax.random.uniform(
        k_e, (num_embeddings, embedding_dim),
        minval=-1.0 / num_embeddings, maxval=1.0 / num_embeddings,
        dtype=jnp.float32)

    q_ref, loss_ref, gap_ref = _reference_forward(inputs, codebook, commitment_cost)

    def check(q_kernel, loss_kernel):
        assert q_kernel.shape == inputs.shape and q_kernel.dtype == inputs.dtype
        q_k = jnp.transpose(q_kernel, (0, 2, 3, 1)).reshape(-1, embedding_dim)
        q_r = jnp.transpose(q_ref, (0, 2, 3, 1)).reshape(-1, embedding_dim)
        row_match = jnp.all(jnp.abs(q_k - q_r) <= 1e-5, axis=1)
        tied = gap_ref <= 1e-4   # either pick is a valid nearest neighbour in f32
        assert bool(jnp.all(row_match | tied)), "quantized mismatch on non-tied rows"
        assert bool(jnp.allclose(loss_kernel, loss_ref, rtol=1e-4, atol=1e-6)), "loss mismatch"

    # Default auto-tiling: batch folded to a single grid step.
    quantized, loss = vector_quantizer_forward(inputs, codebook,
                                               commitment_cost=commitment_cost)
    quantized = jax.block_until_ready(quantized)
    loss = jax.block_until_ready(loss)
    check(quantized, loss)

    # Also exercise a multi-step grid (nb=2, nt=2) via explicit overrides.
    q2, loss2 = vector_quantizer_forward(inputs, codebook,
                                         commitment_cost=commitment_cost,
                                         tile_hw=128, batch_block=1)
    check(jax.block_until_ready(q2), jax.block_until_ready(loss2))

    print("KERNEL_OK")
</pallas_src>

<mosaic_0001>
module attributes {stable_mosaic.version = 11 : i64} {
  func.func @_vq_kernel(%arg0: i32, %arg1: i32, %arg2: memref<2x32x256xf32, #tpu.memory_space<vmem>>, %arg3: memref<64x32xf32, #tpu.memory_space<vmem>>, %arg4: memref<32x64xf32, #tpu.memory_space<vmem>>, %arg5: memref<64x1xf32, #tpu.memory_space<vmem>>, %arg6: memref<2x32x256xf32, #tpu.memory_space<vmem>>, %arg7: memref<1x1x1x256xf32, #tpu.memory_space<vmem>>) attributes {dimension_semantics = [#tpu.dimension_semantics<parallel>, #tpu.dimension_semantics<parallel>], iteration_bounds = array<i64: 1, 1>, scalar_prefetch = 0 : i64, scratch_operands = 0 : i64, tpu.core_type = #tpu.core_type<tc>, window_params = [{transform_indices = @transform_0, window_bounds = array<i64: 2, 32, 256>}, {pipeline_mode = #tpu.pipeline_mode<synchronous>, transform_indices = @transform_1, window_bounds = array<i64: 64, 32>}, {pipeline_mode = #tpu.pipeline_mode<synchronous>, transform_indices = @transform_2, window_bounds = array<i64: 32, 64>}, {pipeline_mode = #tpu.pipeline_mode<synchronous>, transform_indices = @transform_3, window_bounds = array<i64: 64, 1>}, {transform_indices = @transform_4, window_bounds = array<i64: 2, 32, 256>}, {transform_indices = @transform_5, window_bounds = array<i64: 1, 1, 1, 256>}]} {
    %c0 = arith.constant 0 : index
    %c0_0 = arith.constant 0 : index
    %0 = vector.load %arg3[%c0, %c0_0] : memref<64x32xf32, #tpu.memory_space<vmem>>, vector<64x32xf32>
    %c0_1 = arith.constant 0 : index
    %c0_2 = arith.constant 0 : index
    %1 = vector.load %arg4[%c0_1, %c0_2] : memref<32x64xf32, #tpu.memory_space<vmem>>, vector<32x64xf32>
    %c0_3 = arith.constant 0 : index
    %c0_4 = arith.constant 0 : index
    %2 = vector.load %arg5[%c0_3, %c0_4] : memref<64x1xf32, #tpu.memory_space<vmem>>, vector<64x1xf32>
    %3 = tpu.iota {dimensions = array<i32: 0>} : vector<64x256xi32>
    %cst = arith.constant 0.000000e+00 : f32
    %4 = vector.broadcast %cst : f32 to vector<1x256xf32>
    %c0_5 = arith.constant 0 : index
    %c0_6 = arith.constant 0 : index
    %c0_7 = arith.constant 0 : index
    %5 = vector.load %arg2[%c0_5, %c0_6, %c0_7] : memref<2x32x256xf32, #tpu.memory_space<vmem>>, vector<1x32x256xf32>
    %6 = vector.shape_cast %5 : vector<1x32x256xf32> to vector<32x256xf32>
    %cst_8 = arith.constant dense<0.000000e+00> : vector<64x256xf32>
    %7 = tpu.matmul %0, %6, %cst_8 {dimension_numbers = #tpu.dot_dimension_numbers<[1], [0], [0], [1], [0, 0, 1, 1], [], []>} : vector<64x32xf32>, vector<32x256xf32>, vector<64x256xf32> -> vector<64x256xf32>
    %8 = vector.broadcast %2 : vector<64x1xf32> to vector<64x256xf32>
    %9 = arith.subf %8, %7 : vector<64x256xf32>
    %cst_9 = arith.constant dense<0x7F800000> : vector<256xf32>
    %10 = vector.multi_reduction <minimumf>, %9, %cst_9 [0] : vector<64x256xf32> to vector<256xf32>
    %11 = vector.shape_cast %10 : vector<256xf32> to vector<1x256xf32>
    %12 = vector.broadcast %11 : vector<1x256xf32> to vector<64x256xf32>
    %13 = arith.cmpf oeq, %9, %12 : vector<64x256xf32>
    %c64_i32 = arith.constant 64 : i32
    %14 = vector.broadcast %c64_i32 : i32 to vector<64x256xi32>
    %15 = arith.select %13, %3, %14 : vector<64x256xi1>, vector<64x256xi32>
    %cst_10 = arith.constant dense<2147483647> : vector<256xi32>
    %16 = vector.multi_reduction <minsi>, %15, %cst_10 [0] : vector<64x256xi32> to vector<256xi32>
    %17 = vector.shape_cast %16 : vector<256xi32> to vector<1x256xi32>
    %18 = vector.broadcast %17 : vector<1x256xi32> to vector<64x256xi32>
    %19 = arith.cmpi eq, %3, %18 : vector<64x256xi32>
    %20 = arith.extui %19 : vector<64x256xi1> to vector<64x256xi32>
    %21 = arith.sitofp %20 : vector<64x256xi32> to vector<64x256xf32>
    %cst_11 = arith.constant dense<0.000000e+00> : vector<32x256xf32>
    %22 = tpu.matmul %1, %21, %cst_11 {dimension_numbers = #tpu.dot_dimension_numbers<[1], [0], [0], [1], [0, 0, 1, 1], [], []>} : vector<32x64xf32>, vector<64x256xf32>, vector<32x256xf32> -> vector<32x256xf32>
    %c0_12 = arith.constant 0 : index
    %c0_13 = arith.constant 0 : index
    %c0_14 = arith.constant 0 : index
    %23 = vector.load %arg6[%c0_12, %c0_13, %c0_14] : memref<2x32x256xf32, #tpu.memory_space<vmem>>, vector<1x32x256xf32>
    %24 = vector.shape_cast %23 : vector<1x32x256xf32> to vector<32x256xf32>
    %25 = vector.shape_cast %22 : vector<32x256xf32> to vector<1x32x256xf32>
    tpu.vector_store %arg6[%c0_12, %c0_13, %c0_14], %25 {strides = array<i32>} : memref<2x32x256xf32, #tpu.memory_space<vmem>>, vector<1x32x256xf32>,
    %26 = arith.subf %22, %6 : vector<32x256xf32>
    %27 = arith.mulf %26, %26 : vector<32x256xf32>
    %cst_15 = arith.constant dense<0.000000e+00> : vector<256xf32>
    %28 = vector.multi_reduction <add>, %27, %cst_15 [0] : vector<32x256xf32> to vector<256xf32>
    %29 = vector.shape_cast %28 : vector<256xf32> to vector<1x256xf32>
    %30 = arith.addf %4, %29 : vector<1x256xf32>
    %c1 = arith.constant 1 : index
    %c0_16 = arith.constant 0 : index
    %c0_17 = arith.constant 0 : index
    %31 = vector.load %arg2[%c1, %c0_16, %c0_17] : memref<2x32x256xf32, #tpu.memory_space<vmem>>, vector<1x32x256xf32>
    %32 = vector.shape_cast %31 : vector<1x32x256xf32> to vector<32x256xf32>
    %cst_18 = arith.constant dense<0.000000e+00> : vector<64x256xf32>
    %33 = tpu.matmul %0, %32, %cst_18 {dimension_numbers = #tpu.dot_dimension_numbers<[1], [0], [0], [1], [0, 0, 1, 1], [], []>} : vector<64x32xf32>, vector<32x256xf32>, vector<64x256xf32> -> vector<64x256xf32>
    %34 = vector.broadcast %2 : vector<64x1xf32> to vector<64x256xf32>
    %35 = arith.subf %34, %33 : vector<64x256xf32>
    %cst_19 = arith.constant dense<0x7F800000> : vector<256xf32>
    %36 = vector.multi_reduction <minimumf>, %35, %cst_19 [0] : vector<64x256xf32> to vector<256xf32>
    %37 = vector.shape_cast %36 : vector<256xf32> to vector<1x256xf32>
    %38 = vector.broadcast %37 : vector<1x256xf32> to vector<64x256xf32>
    %39 = arith.cmpf oeq, %35, %38 : vector<64x256xf32>
    %c64_i32_20 = arith.constant 64 : i32
    %40 = vector.broadcast %c64_i32_20 : i32 to vector<64x256xi32>
    %41 = arith.select %39, %3, %40 : vector<64x256xi1>, vector<64x256xi32>
    %cst_21 = arith.constant dense<2147483647> : vector<256xi32>
    %42 = vector.multi_reduction <minsi>, %41, %cst_21 [0] : vector<64x256xi32> to vector<256xi32>
    %43 = vector.shape_cast %42 : vector<256xi32> to vector<1x256xi32>
    %44 = vector.broadcast %43 : vector<1x256xi32> to vector<64x256xi32>
    %45 = arith.cmpi eq, %3, %44 : vector<64x256xi32>
    %46 = arith.extui %45 : vector<64x256xi1> to vector<64x256xi32>
    %47 = arith.sitofp %46 : vector<64x256xi32> to vector<64x256xf32>
    %cst_22 = arith.constant dense<0.000000e+00> : vector<32x256xf32>
    %48 = tpu.matmul %1, %47, %cst_22 {dimension_numbers = #tpu.dot_dimension_numbers<[1], [0], [0], [1], [0, 0, 1, 1], [], []>} : vector<32x64xf32>, vector<64x256xf32>, vector<32x256xf32> -> vector<32x256xf32>
    %c1_23 = arith.constant 1 : index
    %c0_24 = arith.constant 0 : index
    %c0_25 = arith.constant 0 : index
    %49 = vector.load %arg6[%c1_23, %c0_24, %c0_25] : memref<2x32x256xf32, #tpu.memory_space<vmem>>, vector<1x32x256xf32>
    %50 = vector.shape_cast %49 : vector<1x32x256xf32> to vector<32x256xf32>
    %51 = vector.shape_cast %48 : vector<32x256xf32> to vector<1x32x256xf32>
    tpu.vector_store %arg6[%c1_23, %c0_24, %c0_25], %51 {strides = array<i32>} : memref<2x32x256xf32, #tpu.memory_space<vmem>>, vector<1x32x256xf32>,
    %52 = arith.subf %48, %32 : vector<32x256xf32>
    %53 = arith.mulf %52, %52 : vector<32x256xf32>
    %cst_26 = arith.constant dense<0.000000e+00> : vector<256xf32>
    %54 = vector.multi_reduction <add>, %53, %cst_26 [0] : vector<32x256xf32> to vector<256xf32>
    %55 = vector.shape_cast %54 : vector<256xf32> to vector<1x256xf32>
    %56 = arith.addf %30, %55 : vector<1x256xf32>
    %57 = vector.shape_cast %56 : vector<1x256xf32> to vector<1x1x1x256xf32>
    %c0_27 = arith.constant 0 : index
    %c0_28 = arith.constant 0 : index
    %c0_29 = arith.constant 0 : index
    %c0_30 = arith.constant 0 : index
    %58 = vector.load %arg7[%c0_27, %c0_28, %c0_29, %c0_30] : memref<1x1x1x256xf32, #tpu.memory_space<vmem>>, vector<1x1x1x256xf32>
    tpu.vector_store %arg7[%c0_27, %c0_28, %c0_29, %c0_30], %57 {strides = array<i32>} : memref<1x1x1x256xf32, #tpu.memory_space<vmem>>, vector<1x1x1x256xf32>,
    return
  }
  func.func @transform_0(%arg0: i32, %arg1: i32) -> (i32, i32, i32) {
    %c0_i32 = arith.constant 0 : i32
    %c0_i32_0 = arith.constant 0 : i32
    return %arg0, %c0_i32, %arg1 : i32, i32, i32
  }
  func.func @transform_1(%arg0: i32, %arg1: i32) -> (i32, i32) {
    %c0_i32 = arith.constant 0 : i32
    %c0_i32_0 = arith.constant 0 : i32
    %c0_i32_1 = arith.constant 0 : i32
    return %c0_i32, %c0_i32_0 : i32, i32
  }
  func.func @transform_2(%arg0: i32, %arg1: i32) -> (i32, i32) {
    %c0_i32 = arith.constant 0 : i32
    %c0_i32_0 = arith.constant 0 : i32
    %c0_i32_1 = arith.constant 0 : i32
    return %c0_i32, %c0_i32_0 : i32, i32
  }
  func.func @transform_3(%arg0: i32, %arg1: i32) -> (i32, i32) {
    %c0_i32 = arith.constant 0 : i32
    %c0_i32_0 = arith.constant 0 : i32
    %c0_i32_1 = arith.constant 0 : i32
    return %c0_i32, %c0_i32_0 : i32, i32
  }
  func.func @transform_4(%arg0: i32, %arg1: i32) -> (i32, i32, i32) {
    %c0_i32 = arith.constant 0 : i32
    %c0_i32_0 = arith.constant 0 : i32
    return %arg0, %c0_i32, %arg1 : i32, i32, i32
  }
  func.func @transform_5(%arg0: i32, %arg1: i32) -> (i32, i32, i32, i32) {
    %c0_i32 = arith.constant 0 : i32
    %c0_i32_0 = arith.constant 0 : i32
    %c0_i32_1 = arith.constant 0 : i32
    return %arg0, %arg1, %c0_i32, %c0_i32_0 : i32, i32, i32, i32
  }
}

module attributes {stable_mosaic.version = 11 : i64} {
  func.func @_vq_kernel(%arg0: i32, %arg1: i32, %arg2: memref<2x32x256xf32, #tpu.memory_space<vmem>>, %arg3: memref<64x32xf32, #tpu.memory_space<vmem>>, %arg4: memref<32x64xf32, #tpu.memory_space<vmem>>, %arg5: memref<64x1xf32, #tpu.memory_space<vmem>>, %arg6: memref<2x32x256xf32, #tpu.memory_space<vmem>>, %arg7: memref<1x1x1x256xf32, #tpu.memory_space<vmem>>) attributes {dimension_semantics = [#tpu.dimension_semantics<parallel>, #tpu.dimension_semantics<parallel>], iteration_bounds = array<i64: 1, 1>, scalar_prefetch = 0 : i64, scratch_operands = 0 : i64, tpu.core_type = #tpu.core_type<tc>, window_params = [{transform_indices = @transform_0, window_bounds = array<i64: 2, 32, 256>}, {pipeline_mode = #tpu.pipeline_mode<synchronous>, transform_indices = @transform_1, window_bounds = array<i64: 64, 32>}, {pipeline_mode = #tpu.pipeline_mode<synchronous>, transform_indices = @transform_2, window_bounds = array<i64: 32, 64>}, {pipeline_mode = #tpu.pipeline_mode<synchronous>, transform_indices = @transform_3, window_bounds = array<i64: 64, 1>}, {transform_indices = @transform_4, window_bounds = array<i64: 2, 32, 256>}, {transform_indices = @transform_5, window_bounds = array<i64: 1, 1, 1, 256>}]} {
    %c0 = arith.constant 0 : index
    %c0_0 = arith.constant 0 : index
    %0 = vector.load %arg3[%c0, %c0_0] : memref<64x32xf32, #tpu.memory_space<vmem>>, vector<64x32xf32>
    %c0_1 = arith.constant 0 : index
    %c0_2 = arith.constant 0 : index
    %1 = vector.load %arg4[%c0_1, %c0_2] : memref<32x64xf32, #tpu.memory_space<vmem>>, vector<32x64xf32>
    %c0_3 = arith.constant 0 : index
    %c0_4 = arith.constant 0 : index
    %2 = vector.load %arg5[%c0_3, %c0_4] : memref<64x1xf32, #tpu.memory_space<vmem>>, vector<64x1xf32>
    %3 = tpu.iota {dimensions = array<i32: 0>} : vector<64x256xi32>
    %cst = arith.constant 0.000000e+00 : f32
    %4 = vector.broadcast %cst : f32 to vector<1x256xf32>
    %c0_5 = arith.constant 0 : index
    %c0_6 = arith.constant 0 : index
    %c0_7 = arith.constant 0 : index
    %5 = vector.load %arg2[%c0_5, %c0_6, %c0_7] : memref<2x32x256xf32, #tpu.memory_space<vmem>>, vector<1x32x256xf32>
    %6 = vector.shape_cast %5 : vector<1x32x256xf32> to vector<32x256xf32>
    %cst_8 = arith.constant dense<0.000000e+00> : vector<64x256xf32>
    %7 = tpu.matmul %0, %6, %cst_8 {dimension_numbers = #tpu.dot_dimension_numbers<[1], [0], [0], [1], [0, 0, 1, 1], [], []>} : vector<64x32xf32>, vector<32x256xf32>, vector<64x256xf32> -> vector<64x256xf32>
    %8 = vector.broadcast %2 : vector<64x1xf32> to vector<64x256xf32>
    %9 = arith.subf %8, %7 : vector<64x256xf32>
    %cst_9 = arith.constant dense<0x7F800000> : vector<256xf32>
    %10 = vector.multi_reduction <minimumf>, %9, %cst_9 [0] : vector<64x256xf32> to vector<256xf32>
    %11 = vector.shape_cast %10 : vector<256xf32> to vector<1x256xf32>
    %12 = vector.broadcast %11 : vector<1x256xf32> to vector<64x256xf32>
    %13 = arith.cmpf oeq, %9, %12 : vector<64x256xf32>
    %c64_i32 = arith.constant 64 : i32
    %14 = vector.broadcast %c64_i32 : i32 to vector<64x256xi32>
    %15 = arith.select %13, %3, %14 : vector<64x256xi1>, vector<64x256xi32>
    %cst_10 = arith.constant dense<2147483647> : vector<256xi32>
    %16 = vector.multi_reduction <minsi>, %15, %cst_10 [0] : vector<64x256xi32> to vector<256xi32>
    %17 = vector.shape_cast %16 : vector<256xi32> to vector<1x256xi32>
    %18 = vector.broadcast %17 : vector<1x256xi32> to vector<64x256xi32>
    %19 = arith.cmpi eq, %3, %18 : vector<64x256xi32>
    %20 = arith.extui %19 : vector<64x256xi1> to vector<64x256xi32>
    %21 = arith.sitofp %20 : vector<64x256xi32> to vector<64x256xf32>
    %cst_11 = arith.constant dense<0.000000e+00> : vector<32x256xf32>
    %22 = tpu.matmul %1, %21, %cst_11 {dimension_numbers = #tpu.dot_dimension_numbers<[1], [0], [0], [1], [0, 0, 1, 1], [], []>} : vector<32x64xf32>, vector<64x256xf32>, vector<32x256xf32> -> vector<32x256xf32>
    %c0_12 = arith.constant 0 : index
    %c0_13 = arith.constant 0 : index
    %c0_14 = arith.constant 0 : index
    %23 = vector.load %arg6[%c0_12, %c0_13, %c0_14] : memref<2x32x256xf32, #tpu.memory_space<vmem>>, vector<1x32x256xf32>
    %24 = vector.shape_cast %23 : vector<1x32x256xf32> to vector<32x256xf32>
    %25 = vector.shape_cast %22 : vector<32x256xf32> to vector<1x32x256xf32>
    tpu.vector_store %arg6[%c0_12, %c0_13, %c0_14], %25 {strides = array<i32>} : memref<2x32x256xf32, #tpu.memory_space<vmem>>, vector<1x32x256xf32>,
    %26 = arith.subf %22, %6 : vector<32x256xf32>
    %27 = arith.mulf %26, %26 : vector<32x256xf32>
    %cst_15 = arith.constant dense<0.000000e+00> : vector<256xf32>
    %28 = vector.multi_reduction <add>, %27, %cst_15 [0] : vector<32x256xf32> to vector<256xf32>
    %29 = vector.shape_cast %28 : vector<256xf32> to vector<1x256xf32>
    %30 = arith.addf %4, %29 : vector<1x256xf32>
    %c1 = arith.constant 1 : index
    %c0_16 = arith.constant 0 : index
    %c0_17 = arith.constant 0 : index
    %31 = vector.load %arg2[%c1, %c0_16, %c0_17] : memref<2x32x256xf32, #tpu.memory_space<vmem>>, vector<1x32x256xf32>
    %32 = vector.shape_cast %31 : vector<1x32x256xf32> to vector<32x256xf32>
    %cst_18 = arith.constant dense<0.000000e+00> : vector<64x256xf32>
    %33 = tpu.matmul %0, %32, %cst_18 {dimension_numbers = #tpu.dot_dimension_numbers<[1], [0], [0], [1], [0, 0, 1, 1], [], []>} : vector<64x32xf32>, vector<32x256xf32>, vector<64x256xf32> -> vector<64x256xf32>
    %34 = vector.broadcast %2 : vector<64x1xf32> to vector<64x256xf32>
    %35 = arith.subf %34, %33 : vector<64x256xf32>
    %cst_19 = arith.constant dense<0x7F800000> : vector<256xf32>
    %36 = vector.multi_reduction <minimumf>, %35, %cst_19 [0] : vector<64x256xf32> to vector<256xf32>
    %37 = vector.shape_cast %36 : vector<256xf32> to vector<1x256xf32>
    %38 = vector.broadcast %37 : vector<1x256xf32> to vector<64x256xf32>
    %39 = arith.cmpf oeq, %35, %38 : vector<64x256xf32>
    %c64_i32_20 = arith.constant 64 : i32
    %40 = vector.broadcast %c64_i32_20 : i32 to vector<64x256xi32>
    %41 = arith.select %39, %3, %40 : vector<64x256xi1>, vector<64x256xi32>
    %cst_21 = arith.constant dense<2147483647> : vector<256xi32>
    %42 = vector.multi_reduction <minsi>, %41, %cst_21 [0] : vector<64x256xi32> to vector<256xi32>
    %43 = vector.shape_cast %42 : vector<256xi32> to vector<1x256xi32>
    %44 = vector.broadcast %43 : vector<1x256xi32> to vector<64x256xi32>
    %45 = arith.cmpi eq, %3, %44 : vector<64x256xi32>
    %46 = arith.extui %45 : vector<64x256xi1> to vector<64x256xi32>
    %47 = arith.sitofp %46 : vector<64x256xi32> to vector<64x256xf32>
    %cst_22 = arith.constant dense<0.000000e+00> : vector<32x256xf32>
    %48 = tpu.matmul %1, %47, %cst_22 {dimension_numbers = #tpu.dot_dimension_numbers<[1], [0], [0], [1], [0, 0, 1, 1], [], []>} : vector<32x64xf32>, vector<64x256xf32>, vector<32x256xf32> -> vector<32x256xf32>
    %c1_23 = arith.constant 1 : index
    %c0_24 = arith.constant 0 : index
    %c0_25 = arith.constant 0 : index
    %49 = vector.load %arg6[%c1_23, %c0_24, %c0_25] : memref<2x32x256xf32, #tpu.memory_space<vmem>>, vector<1x32x256xf32>
    %50 = vector.shape_cast %49 : vector<1x32x256xf32> to vector<32x256xf32>
    %51 = vector.shape_cast %48 : vector<32x256xf32> to vector<1x32x256xf32>
    tpu.vector_store %arg6[%c1_23, %c0_24, %c0_25], %51 {strides = array<i32>} : memref<2x32x256xf32, #tpu.memory_space<vmem>>, vector<1x32x256xf32>,
    %52 = arith.subf %48, %32 : vector<32x256xf32>
    %53 = arith.mulf %52, %52 : vector<32x256xf32>
    %cst_26 = arith.constant dense<0.000000e+00> : vector<256xf32>
    %54 = vector.multi_reduction <add>, %53, %cst_26 [0] : vector<32x256xf32> to vector<256xf32>
    %55 = vector.shape_cast %54 : vector<256xf32> to vector<1x256xf32>
    %56 = arith.addf %30, %55 : vector<1x256xf32>
    %57 = vector.shape_cast %56 : vector<1x256xf32> to vector<1x1x1x256xf32>
    %c0_27 = arith.constant 0 : index
    %c0_28 = arith.constant 0 : index
    %c0_29 = arith.constant 0 : index
    %c0_30 = arith.constant 0 : index
    %58 = vector.load %arg7[%c0_27, %c0_28, %c0_29, %c0_30] : memref<1x1x1x256xf32, #tpu.memory_space<vmem>>, vector<1x1x1x256xf32>
    tpu.vector_store %arg7[%c0_27, %c0_28, %c0_29, %c0_30], %57 {strides = array<i32>} : memref<1x1x1x256xf32, #tpu.memory_space<vmem>>, vector<1x1x1x256xf32>,
    return
  }
  func.func @transform_0(%arg0: i32, %arg1: i32) -> (i32, i32, i32) {
    %c0_i32 = arith.constant 0 : i32
    %c0_i32_0 = arith.constant 0 : i32
    return %arg0, %c0_i32, %arg1 : i32, i32, i32
  }
  func.func @transform_1(%arg0: i32, %arg1: i32) -> (i32, i32) {
    %c0_i32 = arith.constant 0 : i32
    %c0_i32_0 = arith.constant 0 : i32
    %c0_i32_1 = arith.constant 0 : i32
    return %c0_i32, %c0_i32_0 : i32, i32
  }
  func.func @transform_2(%arg0: i32, %arg1: i32) -> (i32, i32) {
    %c0_i32 = arith.constant 0 : i32
    %c0_i32_0 = arith.constant 0 : i32
    %c0_i32_1 = arith.constant 0 : i32
    return %c0_i32, %c0_i32_0 : i32, i32
  }
  func.func @transform_3(%arg0: i32, %arg1: i32) -> (i32, i32) {
    %c0_i32 = arith.constant 0 : i32
    %c0_i32_0 = arith.constant 0 : i32
    %c0_i32_1 = arith.constant 0 : i32
    return %c0_i32, %c0_i32_0 : i32, i32
  }
  func.func @transform_4(%arg0: i32, %arg1: i32) -> (i32, i32, i32) {
    %c0_i32 = arith.constant 0 : i32
    %c0_i32_0 = arith.constant 0 : i32
    return %arg0, %c0_i32, %arg1 : i32, i32, i32
  }
  func.func @transform_5(%arg0: i32, %arg1: i32) -> (i32, i32, i32, i32) {
    %c0_i32 = arith.constant 0 : i32
    %c0_i32_0 = arith.constant 0 : i32
    %c0_i32_1 = arith.constant 0 : i32
    return %arg0, %arg1, %c0_i32, %c0_i32_0 : i32, i32, i32, i32
  }
}

</mosaic_0001>

<bundles_post_ra>
// kernel: _vq_forward_impl.1
= control target key start
LH: loop header
LB: loop body
LE: loop exit
PB: predicated region body
PF: predicated region fallthrough
CT: control target
= control target key end

     0   :  { %v1000_v3 = vmov 0   ;;  %vm56_vm0 = vcmask 261120   ;;  %s1626_s0 = inlined_call_operand.vmem [shape: f32[2,32,256], index: 0, kind: input, shape index: {}]   ;;  %s1627_s3 = inlined_call_operand.vmem [shape: f32[64,1], index: 3, kind: input, shape index: {}]   ;;  %s1628_s1 = inlined_call_operand.vmem [shape: f32[64,32], index: 1, kind: input, shape index: {}]   ;;  %s1629_s2 = inlined_call_operand.vmem [shape: f32[32,64], index: 2, kind: input, shape index: {}]   ;;  %s1630_s4 = inlined_call_operand.vmem [shape: f32[2,32,256], index: 4, kind: output, shape index: {0}]   ;;  %s1631_s5 = inlined_call_operand.vmem [shape: f32[1,1,1,256], index: 5, kind: output, shape index: {1}]  }
   0x1   :  { %v1035_v0 = vld [vmem:[%s1626_s0 + $0x30] sm:$0xff]  ;;  %v1040_v1 = vld [vmem:[%s1626_s0 + $0x38] sm:$0xff]  ;;  %v1045_v2 = vld [vmem:[%s1626_s0 + $0x20] sm:$0xff]  ;;  %997 = vset.pattern.permute.xlu0 %v1000_v3  ;;  %998 = vset.pattern.permute.xlu1 %v1000_v3 }
   0x2   :  { %93 = vmatpush.msra.mxu0 %v1035_v0  ;;  %134 = vmatpush.msra.mxu1 %v1040_v1  ;;  %v1052_v4 = vld [vmem:[%s1626_s0 + $0x28] sm:$0xff]  ;;  %v1057_v5 = vld [vmem:[%s1626_s0 + $0x10] sm:$0xff]  ;;  %v1062_v6 = vld [vmem:[%s1626_s0 + $0x18] sm:$0xff] }
   0x3   :  { %999 = vset.pattern.permute.xlu2 %v1000_v3  ;;  %v31_v7 = vld [vmem:[%s1627_s3] sm:$0xff]  ;;  %v1077_v9 = vld [vmem:[%s1626_s0 + $0x8] sm:$0xff]  ;;  %v33_v10 = vld [vmem:[%s1627_s3 + $0x10] sm:$0xff] }
   0x4   :  { %94 = vmatpush.msra.mxu0 %v1045_v2  ;;  %135 = vmatpush.msra.mxu1 %v1052_v4  ;;  %v1072_v8 = vld [vmem:[%s1626_s0] sm:$0xff]  ;;  %v32_v12 = vld [vmem:[%s1627_s3 + $0x8] sm:$0xff]  ;;  %v34_v13 = vld [vmem:[%s1627_s3 + $0x18] sm:$0xff] }
   0x5   :  { %165 = vperm.xlu0 %997, %v31_v7   ;;  %v1087_v11 = vld [vmem:[%s1628_s1] sm:$0xff]  ;;  %175 = vperm.xlu1 %998, %v33_v10   ;;  %v1104_v14 = vld [vmem:[%s1628_s1 + $0x8] sm:$0xff]  ;;  %v1113_v15 = vld [vmem:[%s1628_s1 + $0x10] sm:$0xff] }
   0x6   :  { %95 = vmatpush.msra.mxu0 %v1057_v5  ;;  %136 = vmatpush.msra.mxu1 %v1062_v6  ;;  %v38_v16 = vld [vmem:[%s1627_s3 + $0x38] sm:$0xff]  ;;  %v37_v17 = vld [vmem:[%s1627_s3 + $0x30] sm:$0xff]  ;;  %v35_v19 = vld [vmem:[%s1627_s3 + $0x20] sm:$0xff] }
   0x7   :  { %v1128_v18 = vld [vmem:[%s1628_s1 + $0x18] sm:$0xff]  ;;  %185 = vperm.xlu2 %999, %v35_v19   ;;  %v1140_v20 = vld [vmem:[%s1628_s1 + $0x20] sm:$0xff]  ;;  %v36_v21 = vld [vmem:[%s1627_s3 + $0x28] sm:$0xff] }
   0x8   :  { %96 = vmatpush.msra.mxu0 %v1072_v8  ;;  %137 = vmatpush.msra.mxu1 %v1077_v9  ;;  %v1152_v22 = vld [vmem:[%s1628_s1 + $0x28] sm:$0xff]  ;;  %v1161_v23 = vld [vmem:[%s1628_s1 + $0x30] sm:$0xff]  ;;  %v1170_v24 = vld [vmem:[%s1628_s1 + $0x38] sm:$0xff] }
   0x9   :  { %867 = vmatmul.msk.f32.vlgmr.msra.gmra.mxu0 %vm56_vm0, %v1087_v11  ;;  %875 = vmatmul.msk.f32.vlgmr.msra.gmra.mxu1 %vm56_vm0, %v1087_v11 }
   0xd   :  { %170 = vperm.xlu0 %997, %v32_v12   ;;  %180 = vperm.xlu1 %998, %v34_v13  }
   0xf   :  { %190 = vperm.xlu2 %999, %v36_v21  }
  0x11   :  { %868 = vmatmul.msk.f32.gmra.mxu0 %vm56_vm0, %v1104_v14  ;;  %876 = vmatmul.msk.f32.gmra.mxu1 %vm56_vm0, %v1104_v14 }
  0x15   :  { %200 = vperm.xlu1 %998, %v38_v16   ;;  %195 = vperm.xlu0 %997, %v37_v17  }
  0x19   :  { %869 = vmatmul.msk.f32.gmra.mxu0 %vm56_vm0, %v1113_v15  ;;  %877 = vmatmul.msk.f32.gmra.mxu1 %vm56_vm0, %v1113_v15 }
  0x21   :  { %870 = vmatmul.msk.f32.gmra.mxu0 %vm56_vm0, %v1128_v18  ;;  %878 = vmatmul.msk.f32.gmra.mxu1 %vm56_vm0, %v1128_v18 }
  0x29   :  { %871 = vmatmul.msk.f32.gmra.mxu0 %vm56_vm0, %v1140_v20  ;;  %879 = vmatmul.msk.f32.gmra.mxu1 %vm56_vm0, %v1140_v20 }
  0x31   :  { %872 = vmatmul.msk.f32.gmra.mxu0 %vm56_vm0, %v1152_v22  ;;  %880 = vmatmul.msk.f32.gmra.mxu1 %vm56_vm0, %v1152_v22 }
  0x39   :  { %873 = vmatmul.msk.f32.gmra.mxu0 %vm56_vm0, %v1161_v23  ;;  %881 = vmatmul.msk.f32.gmra.mxu1 %vm56_vm0, %v1161_v23 }
  0x41   :  { %874 = vmatmul.msk.f32.gmra.mxu0 %vm56_vm0, %v1170_v24  ;;  %882 = vmatmul.msk.f32.gmra.mxu1 %vm56_vm0, %v1170_v24 }
  0x61   :  { %v1180_v37 = vpop.permute.xlu2 %185 }
  0x69   :  { %v1192_v46 = vpop.permute.xlu2 %190 }
  0x77   :  { %v1176_v35 = vpop.permute.xlu0 %165  ;;  %v1178_v36 = vpop.permute.xlu1 %175 }
  0x7f   :  { %v1182_v40 = vpop.permute.xlu0 %170  ;;  %v1184_v41 = vpop.permute.xlu1 %180 }
  0x86   :  { %v98_v25 = vpop.f32.mrf.mxu0  ;;  %v139_v26 = vpop.f32.mrf.mxu1 }
  0x87   :  { %v203_v49 = vsub.f32 %v1176_v35, %v98_v25  ;;  %v1202_v50 = vsub.f32 %v1176_v35, %v139_v26  ;;  %v1219_v59 = vpop.permute.xlu0 %195  ;;  %v1224_v62 = vpop.permute.xlu1 %200 }
  0x8e   :  { %v101_v27 = vpop.f32.mrf.mxu0  ;;  %v142_v28 = vpop.f32.mrf.mxu1 }
  0x8f   :  { %v205_v53 = vsub.f32 %v1182_v40, %v101_v27  ;;  %v1210_v54 = vsub.f32 %v1182_v40, %v142_v28 }
  0x96   :  { %v104_v29 = vpop.f32.mrf.mxu0  ;;  %v145_v30 = vpop.f32.mrf.mxu1 }
  0x97   :  { %v1187_v44 = vsub.f32 %v1178_v36, %v104_v29  ;;  %v1190_v45 = vsub.f32 %v1178_v36, %v145_v30 }
  0x99   :  { %v219_v57 = vmin.f32 %v203_v49, %v1187_v44  ;;  %v232_v58 = vmin.f32 %v1202_v50, %v1190_v45 }
  0x9e   :  { %v107_v31 = vpop.f32.mrf.mxu0  ;;  %v148_v32 = vpop.f32.mrf.mxu1 }
  0x9f   :  { %v1195_v47 = vsub.f32 %v1184_v41, %v107_v31  ;;  %v1198_v48 = vsub.f32 %v1184_v41, %v148_v32 }
  0xa1   :  { %v220_v60 = vmin.f32 %v205_v53, %v1195_v47  ;;  %v233_v61 = vmin.f32 %v1210_v54, %v1198_v48 }
  0xa6   :  { %v110_v33 = vpop.f32.mrf.mxu0  ;;  %v151_v34 = vpop.f32.mrf.mxu1 }
  0xa7   :  { %v211_v51 = vsub.f32 %v1180_v37, %v110_v33  ;;  %v1206_v52 = vsub.f32 %v1180_v37, %v151_v34  ;;  %v39_v33 = vlaneseq }
  0xa9   :  { %v221_v7 = vmin.f32 %v219_v57, %v211_v51  ;;  %v234_v10 = vmin.f32 %v232_v58, %v1206_v52 }
  0xae   :  { %v113_v38 = vpop.f32.mrf.mxu0  ;;  %v154_v39 = vpop.f32.mrf.mxu1 }
  0xaf   :  { %v213_v55 = vsub.f32 %v1192_v46, %v113_v38  ;;  %v1214_v56 = vsub.f32 %v1192_v46, %v154_v39 }
  0xb1   :  { %v222_v16 = vmin.f32 %v220_v60, %v213_v55  ;;  %v235_v17 = vmin.f32 %v233_v61, %v1214_v56 }
  0xb6   :  { %v116_v42 = vpop.f32.mrf.mxu0  ;;  %v157_v43 = vpop.f32.mrf.mxu1 }
  0xb7   :  { %v215_v63 = vsub.f32 %v1219_v59, %v116_v42  ;;  %v1228_v3 = vsub.f32 %v1219_v59, %v157_v43  ;;  %v1239_v43 = vshrl.u32 %v39_v33, 7 }
  0xb9   :  { %v223_v25 = vmin.f32 %v221_v7, %v215_v63  ;;  %v236_v26 = vmin.f32 %v234_v10, %v1228_v3  ;;  %v1242_v7 = vadd.s32 8, %v1239_v43  ;;  %v1245_v10 = vadd.s32 16, %v1239_v43 }
  0xbe   :  { %v119_v12 = vpop.f32.mrf.mxu0  ;;  %v160_v13 = vpop.f32.mrf.mxu1 }
  0xbf   :  { %v217_v19 = vsub.f32 %v1224_v62, %v119_v12  ;;  %v1234_v21 = vsub.f32 %v1224_v62, %v160_v13  ;;  %v1248_v12 = vadd.s32 24, %v1239_v43  ;;  %v1251_v13 = vadd.s32 32, %v1239_v43 }
  0xc1   :  { %v224_v27 = vmin.f32 %v222_v16, %v217_v19  ;;  %v237_v28 = vmin.f32 %v235_v17, %v1234_v21  ;;  %v1254_v17 = vadd.s32 40, %v1239_v43 }
  0xc3   :  { %v225_v29 = vmin.f32 %v223_v25, %v224_v27  ;;  %v238_v30 = vmin.f32 %v236_v26, %v237_v28  ;;  %v1257_v25 = vadd.s32 48, %v1239_v43  ;;  %v1260_v26 = vadd.s32 56, %v1239_v43 }
  0xc5   :  { %v226_v31 = vrot.slane %v225_v29, 4  ;;  %v239_v32 = vrot.slane %v238_v30, 4 }
  0xc7   :  { %v227_v34 = vmin.f32 %v225_v29, %v226_v31  ;;  %v240_v38 = vmin.f32 %v238_v30, %v239_v32 }
  0xc9   :  { %v228_v39 = vrot.slane %v227_v34, 2  ;;  %v241_v42 = vrot.slane %v240_v38, 2 }
  0xcb   :  { %v229_v57 = vmin.f32 %v227_v34, %v228_v39  ;;  %v242_v58 = vmin.f32 %v240_v38, %v241_v42 }
  0xcd   :  { %v230_v60 = vrot.slane %v229_v57, 1  ;;  %v243_v61 = vrot.slane %v242_v58, 1 }
  0xcf   :  { %v231_v16 = vmin.f32 %v229_v57, %v230_v60  ;;  %v244_v27 = vmin.f32 %v242_v58, %v243_v61 }
  0xd1   :  { %vm245_vm1 = vcmp.eq.f32.partialorder %v203_v49, %v231_v16  ;;  %vm247_vm2 = vcmp.eq.f32.partialorder %v205_v53, %v231_v16  ;;  %vm249_vm3 = vcmp.eq.f32.partialorder %v1187_v44, %v231_v16  ;;  %vm251_vm4 = vcmp.eq.f32.partialorder %v1195_v47, %v231_v16 }
  0xd2   :  { %vm253_vm5 = vcmp.eq.f32.partialorder %v211_v51, %v231_v16  ;;  %vm255_vm6 = vcmp.eq.f32.partialorder %v213_v55, %v231_v16  ;;  %vm257_vm7 = vcmp.eq.f32.partialorder %v215_v63, %v231_v16  ;;  %vm259_vm8 = vcmp.eq.f32.partialorder %v217_v19, %v231_v16 }
  0xd3   :  { %v261_v28 = vsel %vm245_vm1, %v1239_v43, 64  ;;  %v263_v29 = vsel %vm247_vm2, %v1242_v7, 64  ;;  %v265_v30 = vsel %vm249_vm3, %v1245_v10, 64  ;;  %v267_v31 = vsel %vm251_vm4, %v1248_v12, 64 }
  0xd4   :  { %v269_v32 = vsel %vm253_vm5, %v1251_v13, 64  ;;  %v271_v49 = vsel %vm255_vm6, %v1254_v17, 64  ;;  %v273_v44 = vsel %vm257_vm7, %v1257_v25, 64  ;;  %v275_v47 = vsel %vm259_vm8, %v1260_v26, 64 }
  0xd5   :  { %vm277_vm9 = vcmp.lt.s32.totalorder %v261_v28, %v265_v30  ;;  %vm279_vm10 = vcmp.lt.s32.totalorder %v263_v29, %v267_v31  ;;  %vm246_vm11 = vcmp.eq.f32.partialorder %v1202_v50, %v244_v27  ;;  %vm248_vm12 = vcmp.eq.f32.partialorder %v1210_v54, %v244_v27 }
  0xd6   :  { %v278_v51 = vsel %vm277_vm9, %v261_v28, %v265_v30  ;;  %v280_v53 = vsel %vm279_vm10, %v263_v29, %v267_v31  ;;  %vm250_vm15 = vcmp.eq.f32.partialorder %v1190_v45, %v244_v27  ;;  %vm252_vm1 = vcmp.eq.f32.partialorder %v1198_v48, %v244_v27 }
  0xd7   :  { %vm281_vm13 = vcmp.lt.s32.totalorder %v278_v51, %v269_v32  ;;  %vm283_vm14 = vcmp.lt.s32.totalorder %v280_v53, %v271_v49  ;;  %vm254_vm2 = vcmp.eq.f32.partialorder %v1206_v52, %v244_v27  ;;  %vm256_vm3 = vcmp.eq.f32.partialorder %v1214_v56, %v244_v27 }
  0xd8   :  { %v282_v55 = vsel %vm281_vm13, %v278_v51, %v269_v32  ;;  %v284_v63 = vsel %vm283_vm14, %v280_v53, %v271_v49  ;;  %v262_v19 = vsel %vm246_vm11, %v1239_v43, 64  ;;  %v264_v50 = vsel %vm248_vm12, %v1242_v7, 64 }
  0xd9   :  { %vm285_vm4 = vcmp.lt.s32.totalorder %v282_v55, %v273_v44  ;;  %vm287_vm5 = vcmp.lt.s32.totalorder %v284_v63, %v275_v47  ;;  %v266_v38 = vsel %vm250_vm15, %v1245_v10, 64  ;;  %v268_v45 = vsel %vm252_vm1, %v1248_v12, 64 }
  0xda   :  { %v286_v34 = vsel %vm285_vm4, %v282_v55, %v273_v44  ;;  %v288_v54 = vsel %vm287_vm5, %v284_v63, %v275_v47  ;;  %vm258_vm7 = vcmp.eq.f32.partialorder %v1228_v3, %v244_v27  ;;  %vm260_vm8 = vcmp.eq.f32.partialorder %v1234_v21, %v244_v27 }
  0xdb   :  { %vm289_vm6 = vcmp.lt.s32.totalorder %v286_v34, %v288_v54  ;;  %v270_v52 = vsel %vm254_vm2, %v1251_v13, 64  ;;  %vm300_vm9 = vcmp.lt.s32.totalorder %v262_v19, %v266_v38  ;;  %vm302_vm10 = vcmp.lt.s32.totalorder %v264_v50, %v268_v45 }
  0xdc   :  { %v290_v48 = vsel %vm289_vm6, %v286_v34, %v288_v54  ;;  %v272_v42 = vsel %vm256_vm3, %v1254_v17, 64  ;;  %v301_v57 = vsel %vm300_vm9, %v262_v19, %v266_v38  ;;  %v303_v58 = vsel %vm302_vm10, %v264_v50, %v268_v45  ;;  %v1314_v19 = vld [vmem:[%s1629_s2] sm:$0xff]  ;;  %v1323_v50 = vld [vmem:[%s1626_s0 + $0x70] sm:$0xff]  ;;  %v1353_v45 = vld [vmem:[%s1629_s2 + $0x8] sm:$0xff] }
  0xdd   :  { %v291_v39 = vrot.slane %v290_v48, 4  ;;  %v274_v60 = vsel %vm258_vm7, %v1257_v25, 64  ;;  %vm304_vm11 = vcmp.lt.s32.totalorder %v301_v57, %v270_v52  ;;  %vm306_vm12 = vcmp.lt.s32.totalorder %v303_v58, %v272_v42  ;;  %v1331_v34 = vld [vmem:[%s1626_s0 + $0x60] sm:$0xff]  ;;  %v1339_v54 = vld [vmem:[%s1626_s0 + $0x50] sm:$0xff] }
  0xde   :  { %v276_v3 = vsel %vm260_vm8, %v1260_v26, 64  ;;  %v305_v21 = vsel %vm304_vm11, %v301_v57, %v270_v52  ;;  %v307_v61 = vsel %vm306_vm12, %v303_v58, %v272_v42  ;;  %v1001_v51 = vmov 1.0   ;;  %v1347_v38 = vld [vmem:[%s1626_s0 + $0x40] sm:$0xff]  ;;  %v1367_v52 = vld [vmem:[%s1626_s0 + $0x68] sm:$0xff]  ;;  %v1388_v57 = vld [vmem:[%s1629_s2 + $0x10] sm:$0xff] }
  0xdf   :  { %vm292_vm13 = vcmp.lt.s32.totalorder %v290_v48, %v291_v39  ;;  %vm308_vm14 = vcmp.lt.s32.totalorder %v305_v21, %v274_v60  ;;  %vm310_vm15 = vcmp.lt.s32.totalorder %v307_v61, %v276_v3  ;;  %v1382_v42 = vld [vmem:[%s1626_s0 + $0x48] sm:$0xff]  ;;  %v1398_v58 = vld [vmem:[%s1629_s2 + $0x18] sm:$0xff] }
  0xe0   :  { %v293_v16 = vsel %vm292_vm13, %v290_v48, %v291_v39  ;;  %v309_v29 = vsel %vm308_vm14, %v305_v21, %v274_v60  ;;  %v311_v30 = vsel %vm310_vm15, %v307_v61, %v276_v3  ;;  %v1358_v48 = vld [vmem:[%s1626_s0 + $0x78] sm:$0xff] }
  0xe1   :  { %v294_v28 = vrot.slane %v293_v16, 2  ;;  %vm312_vm1 = vcmp.lt.s32.totalorder %v309_v29, %v311_v30  ;;  %v1376_v39 = vld [vmem:[%s1626_s0 + $0x58] sm:$0xff] }
  0xe2   :  { %v313_v56 = vsel %vm312_vm1, %v309_v29, %v311_v30 }
  0xe3   :  { %vm295_vm2 = vcmp.lt.s32.totalorder %v293_v16, %v294_v28  ;;  %v314_v31 = vrot.slane %v313_v56, 4 }
  0xe4   :  { %v296_v27 = vsel %vm295_vm2, %v293_v16, %v294_v28 }
  0xe5   :  { %v297_v32 = vrot.slane %v296_v27, 1  ;;  %vm315_vm3 = vcmp.lt.s32.totalorder %v313_v56, %v314_v31 }
  0xe6   :  { %v316_v49 = vsel %vm315_vm3, %v313_v56, %v314_v31  ;;  %vm371_vm3 = vcmask 523264  }
  0xe7   :  { %vm298_vm4 = vcmp.lt.s32.totalorder %v296_v27, %v297_v32  ;;  %v317_v47 = vrot.slane %v316_v49, 2 }
  0xe8   :  { %v299_v44 = vsel %vm298_vm4, %v296_v27, %v297_v32 }
  0xe9   :  { %vm337_vm5 = vcmp.eq.s32.totalorder %v1260_v26, %v299_v44  ;;  %vm318_vm6 = vcmp.lt.s32.totalorder %v316_v49, %v317_v47  ;;  %vm335_vm7 = vcmp.eq.s32.totalorder %v1257_v25, %v299_v44  ;;  %vm333_vm8 = vcmp.eq.s32.totalorder %v1254_v17, %v299_v44 }
  0xea   :  { %899 = vmatpush.msk.msra.mxu2 %vm337_vm5, %v1001_v51  ;;  %v319_v53 = vsel %vm318_vm6, %v316_v49, %v317_v47  ;;  %vm331_vm10 = vcmp.eq.s32.totalorder %v1251_v13, %v299_v44  ;;  %vm329_vm12 = vcmp.eq.s32.totalorder %v1248_v12, %v299_v44  ;;  %vm327_vm14 = vcmp.eq.s32.totalorder %v1245_v10, %v299_v44 }
  0xeb   :  { %v320_v55 = vrot.slane %v319_v53, 1  ;;  %vm325_vm1 = vcmp.eq.s32.totalorder %v1242_v7, %v299_v44  ;;  %vm323_vm4 = vcmp.eq.s32.totalorder %v1239_v43, %v299_v44 }
  0xec   :  { %900 = vmatpush.msk.msra.mxu2 %vm335_vm7, %v1001_v51 }
  0xed   :  { %vm321_vm9 = vcmp.lt.s32.totalorder %v319_v53, %v320_v55 }
  0xee   :  { %901 = vmatpush.msk.msra.mxu2 %vm333_vm8, %v1001_v51  ;;  %v322_v63 = vsel %vm321_vm9, %v319_v53, %v320_v55 }
  0xef   :  { %vm338_vm11 = vcmp.eq.s32.totalorder %v1260_v26, %v322_v63  ;;  %vm336_vm13 = vcmp.eq.s32.totalorder %v1257_v25, %v322_v63  ;;  %vm334_vm15 = vcmp.eq.s32.totalorder %v1254_v17, %v322_v63  ;;  %vm332_vm2 = vcmp.eq.s32.totalorder %v1251_v13, %v322_v63 }
  0xf0   :  { %902 = vmatpush.msk.msra.mxu2 %vm331_vm10, %v1001_v51  ;;  %911 = vmatpush.msk.msra.mxu3 %vm338_vm11, %v1001_v51  ;;  %vm330_vm5 = vcmp.eq.s32.totalorder %v1248_v12, %v322_v63  ;;  %vm328_vm6 = vcmp.eq.s32.totalorder %v1245_v10, %v322_v63  ;;  %vm326_vm7 = vcmp.eq.s32.totalorder %v1242_v7, %v322_v63 }
  0xf1   :  { %vm324_vm8 = vcmp.eq.s32.totalorder %v1239_v43, %v322_v63 }
  0xf2   :  { %903 = vmatpush.msk.msra.mxu2 %vm329_vm12, %v1001_v51  ;;  %912 = vmatpush.msk.msra.mxu3 %vm336_vm13, %v1001_v51 }
  0xf4   :  { %904 = vmatpush.msk.msra.mxu2 %vm327_vm14, %v1001_v51  ;;  %913 = vmatpush.msk.msra.mxu3 %vm334_vm15, %v1001_v51 }
  0xf6   :  { %905 = vmatpush.msk.msra.mxu2 %vm325_vm1, %v1001_v51  ;;  %914 = vmatpush.msk.msra.mxu3 %vm332_vm2, %v1001_v51 }
  0xf8   :  { %906 = vmatpush.msk.msra.mxu2 %vm323_vm4, %v1001_v51  ;;  %915 = vmatpush.msk.msra.mxu3 %vm330_vm5, %v1001_v51 }
  0xf9   :  { %907 = vmatmul.msk.f32.vlgmr.msra.gmra.mxu2 %vm371_vm3, %v1314_v19 }
  0xfa   :  { %507 = vmatpush.msrb.mxu2 %v1323_v50  ;;  %916 = vmatpush.msk.msra.mxu3 %vm328_vm6, %v1001_v51 }
  0xfc   :  { %508 = vmatpush.msrb.mxu2 %v1331_v34  ;;  %917 = vmatpush.msk.msra.mxu3 %vm326_vm7, %v1001_v51 }
  0xfe   :  { %509 = vmatpush.msrb.mxu2 %v1339_v54  ;;  %918 = vmatpush.msk.msra.mxu3 %vm324_vm8, %v1001_v51 }
  0xff   :  { %919 = vmatmul.msk.f32.vlgmr.msra.gmra.mxu3 %vm371_vm3, %v1314_v19 }
 0x100   :  { %510 = vmatpush.msrb.mxu2 %v1347_v38  ;;  %548 = vmatpush.msrb.mxu3 %v1358_v48 }
 0x101   :  { %908 = vmatmul.msk.f32.gmra.mxu2 %vm371_vm3, %v1353_v45 }
 0x102   :  { %549 = vmatpush.msrb.mxu3 %v1367_v52 }
 0x104   :  { %550 = vmatpush.msrb.mxu3 %v1376_v39 }
 0x106   :  { %551 = vmatpush.msrb.mxu3 %v1382_v42 }
 0x107   :  { %920 = vmatmul.msk.f32.gmra.mxu3 %vm371_vm3, %v1353_v45 }
 0x109   :  { %909 = vmatmul.msk.f32.gmra.mxu2 %vm371_vm3, %v1388_v57 }
 0x10f   :  { %921 = vmatmul.msk.f32.gmra.mxu3 %vm371_vm3, %v1388_v57 }
 0x111   :  { %910 = vmatmul.msk.f32.gmra.mxu2 %vm371_vm3, %v1398_v58 }
 0x117   :  { %922 = vmatmul.msk.f32.gmra.mxu3 %vm371_vm3, %v1398_v58 }
 0x119   :  { %931 = vmatmul.msk.f32.vlgmr.msrb.gmra.mxu2 %vm56_vm0, %v1087_v11 }
 0x11f   :  { %939 = vmatmul.msk.f32.vlgmr.msrb.gmra.mxu3 %vm56_vm0, %v1087_v11 }
 0x121   :  { %932 = vmatmul.msk.f32.gmra.mxu2 %vm56_vm0, %v1104_v14 }
 0x127   :  { %940 = vmatmul.msk.f32.gmra.mxu3 %vm56_vm0, %v1104_v14 }
 0x129   :  { %933 = vmatmul.msk.f32.gmra.mxu2 %vm56_vm0, %v1113_v15 }
 0x12f   :  { %941 = vmatmul.msk.f32.gmra.mxu3 %vm56_vm0, %v1113_v15 }
 0x131   :  { %934 = vmatmul.msk.f32.gmra.mxu2 %vm56_vm0, %v1128_v18 }
 0x137   :  { %942 = vmatmul.msk.f32.gmra.mxu3 %vm56_vm0, %v1128_v18 }
 0x139   :  { %935 = vmatmul.msk.f32.gmra.mxu2 %vm56_vm0, %v1140_v20 }
 0x13f   :  { %943 = vmatmul.msk.f32.gmra.mxu3 %vm56_vm0, %v1140_v20 }
 0x141   :  { %936 = vmatmul.msk.f32.gmra.mxu2 %vm56_vm0, %v1152_v22 }
 0x147   :  { %944 = vmatmul.msk.f32.gmra.mxu3 %vm56_vm0, %v1152_v22 }
 0x149   :  { %937 = vmatmul.msk.f32.gmra.mxu2 %vm56_vm0, %v1161_v23 }
 0x14f   :  { %945 = vmatmul.msk.f32.gmra.mxu3 %vm56_vm0, %v1161_v23 }
 0x151   :  { %938 = vmatmul.msk.f32.gmra.mxu2 %vm56_vm0, %v1170_v24 }
 0x157   :  { %946 = vmatmul.msk.f32.gmra.mxu3 %vm56_vm0, %v1170_v24 }
 0x17c   :  { %v401_v11 = vpop.f32.mrf.mxu2 }
 0x17d   :  { %442 = vst [vmem:[%s1630_s4] sm:$0xff] %v401_v11  ;;  %v450_v14 = vsub.f32 %v401_v11, %v1072_v8 }
 0x17f   :  { %v458_v22 = vmul.f32 %v450_v14, %v450_v14 }
 0x182   :  { %v430_v15 = vpop.f32.mrf.mxu3 }
 0x183   :  { %443 = vst [vmem:[%s1630_s4 + $0x8] sm:$0xff] %v430_v15  ;;  %v451_v60 = vsub.f32 %v430_v15, %v1077_v9 }
 0x184   :  { %v404_v18 = vpop.f32.mrf.mxu2 }
 0x185   :  { %444 = vst [vmem:[%s1630_s4 + $0x10] sm:$0xff] %v404_v18  ;;  %v452_v20 = vsub.f32 %v404_v18, %v1057_v5  ;;  %v459_v5 = vmul.f32 %v451_v60, %v451_v60 }
 0x187   :  { %v460_v23 = vmul.f32 %v452_v20, %v452_v20 }
 0x189   :  { %v466_v24 = vadd.f32 %v460_v23, %v458_v22 }
 0x18a   :  { %v433_v3 = vpop.f32.mrf.mxu3 }
 0x18b   :  { %445 = vst [vmem:[%s1630_s4 + $0x18] sm:$0xff] %v433_v3  ;;  %v453_v8 = vsub.f32 %v433_v3, %v1062_v6 }
 0x18c   :  { %v407_v21 = vpop.f32.mrf.mxu2 }
 0x18d   :  { %446 = vst [vmem:[%s1630_s4 + $0x20] sm:$0xff] %v407_v21  ;;  %v454_v61 = vsub.f32 %v407_v21, %v1045_v2  ;;  %v461_v16 = vmul.f32 %v453_v8, %v453_v8 }
 0x18f   :  { %v462_v28 = vmul.f32 %v454_v61, %v454_v61  ;;  %v475_v29 = vadd.f32 %v461_v16, %v459_v5 }
 0x191   :  { %v467_v30 = vadd.f32 %v466_v24, %v462_v28 }
 0x192   :  { %v436_v9 = vpop.f32.mrf.mxu3 }
 0x193   :  { %447 = vst [vmem:[%s1630_s4 + $0x28] sm:$0xff] %v436_v9  ;;  %v455_v56 = vsub.f32 %v436_v9, %v1052_v4 }
 0x194   :  { %v410_v6 = vpop.f32.mrf.mxu2 }
 0x195   :  { %448 = vst [vmem:[%s1630_s4 + $0x30] sm:$0xff] %v410_v6  ;;  %v456_v27 = vsub.f32 %v410_v6, %v1035_v0  ;;  %v463_v2 = vmul.f32 %v455_v56, %v455_v56 }
 0x197   :  { %v464_v31 = vmul.f32 %v456_v27, %v456_v27  ;;  %v476_v32 = vadd.f32 %v475_v29, %v463_v2 }
 0x199   :  { %v1466_v49 = vadd.f32 %v467_v30, %v464_v31 }
 0x19a   :  { %v439_v44 = vpop.f32.mrf.mxu3 }
 0x19b   :  { %449 = vst [vmem:[%s1630_s4 + $0x38] sm:$0xff] %v439_v44  ;;  %v457_v47 = vsub.f32 %v439_v44, %v1040_v1 }
 0x19c   :  { %v512_v4 = vpop.f32.mrf.mxu2 }
 0x19d   :  { %v465_v53 = vmul.f32 %v457_v47, %v457_v47  ;;  %v577_v21 = vsub.f32 %v1176_v35, %v512_v4 }
 0x19f   :  { %v1472_v55 = vadd.f32 %v476_v32, %v465_v53 }
 0x1a2   :  { %v553_v63 = vpop.f32.mrf.mxu3 }
 0x1a3   :  { %v1489_v4 = vsub.f32 %v1176_v35, %v553_v63 }
 0x1a4   :  { %v515_v11 = vpop.f32.mrf.mxu2 }
 0x1a5   :  { %v579_v61 = vsub.f32 %v1182_v40, %v515_v11 }
 0x1aa   :  { %v556_v14 = vpop.f32.mrf.mxu3 }
 0x1ab   :  { %v1492_v53 = vsub.f32 %v1182_v40, %v556_v14 }
 0x1ac   :  { %v518_v0 = vpop.f32.mrf.mxu2 }
 0x1ad   :  { %v581_v8 = vsub.f32 %v1178_v36, %v518_v0 }
 0x1af   :  { %v593_v28 = vmin.f32 %v577_v21, %v581_v8 }
 0x1b2   :  { %v559_v15 = vpop.f32.mrf.mxu3 }
 0x1b3   :  { %v1483_v31 = vsub.f32 %v1178_v36, %v559_v15 }
 0x1b4   :  { %v521_v18 = vpop.f32.mrf.mxu2 }
 0x1b5   :  { %v583_v1 = vsub.f32 %v1184_v41, %v521_v18  ;;  %v606_v36 = vmin.f32 %v1489_v4, %v1483_v31 }
 0x1b7   :  { %v594_v29 = vmin.f32 %v579_v61, %v583_v1 }
 0x1ba   :  { %v562_v20 = vpop.f32.mrf.mxu3 }
 0x1bb   :  { %v1486_v32 = vsub.f32 %v1184_v41, %v562_v20 }
 0x1bc   :  { %v524_v22 = vpop.f32.mrf.mxu2 }
 0x1bd   :  { %v585_v5 = vsub.f32 %v1180_v37, %v524_v22  ;;  %v607_v41 = vmin.f32 %v1492_v53, %v1486_v32 }
 0x1bf   :  { %v595_v6 = vmin.f32 %v593_v28, %v585_v5 }
 0x1c2   :  { %v565_v23 = vpop.f32.mrf.mxu3 }
 0x1c3   :  { %v1495_v11 = vsub.f32 %v1180_v37, %v565_v23 }
 0x1c4   :  { %v527_v24 = vpop.f32.mrf.mxu2 }
 0x1c5   :  { %v587_v16 = vsub.f32 %v1192_v46, %v527_v24  ;;  %v608_v40 = vmin.f32 %v606_v36, %v1495_v11 }
 0x1c7   :  { %v596_v27 = vmin.f32 %v594_v29, %v587_v16 }
 0x1ca   :  { %v568_v60 = vpop.f32.mrf.mxu3 }
 0x1cb   :  { %v1498_v0 = vsub.f32 %v1192_v46, %v568_v60 }
 0x1cc   :  { %v530_v3 = vpop.f32.mrf.mxu2 }
 0x1cd   :  { %v589_v30 = vsub.f32 %v1219_v59, %v530_v3  ;;  %v609_v37 = vmin.f32 %v607_v41, %v1498_v0 }
 0x1cf   :  { %v597_v44 = vmin.f32 %v595_v6, %v589_v30 }
 0x1d2   :  { %v571_v9 = vpop.f32.mrf.mxu3 }
 0x1d3   :  { %v1505_v15 = vsub.f32 %v1219_v59, %v571_v9 }
 0x1d4   :  { %v533_v56 = vpop.f32.mrf.mxu2 }
 0x1d5   :  { %v591_v2 = vsub.f32 %v1224_v62, %v533_v56  ;;  %v610_v20 = vmin.f32 %v608_v40, %v1505_v15 }
 0x1d7   :  { %v598_v47 = vmin.f32 %v596_v27, %v591_v2 }
 0x1d9   :  { %v599_v18 = vmin.f32 %v597_v44, %v598_v47 }
 0x1da   :  { %v574_v63 = vpop.f32.mrf.mxu3 }
 0x1db   :  { %v600_v35 = vrot.slane %v599_v18, 4  ;;  %v1510_v14 = vsub.f32 %v1224_v62, %v574_v63 }
 0x1dd   :  { %v601_v46 = vmin.f32 %v599_v18, %v600_v35  ;;  %v611_v22 = vmin.f32 %v609_v37, %v1510_v14 }
 0x1df   :  { %v602_v23 = vrot.slane %v601_v46, 2  ;;  %v612_v24 = vmin.f32 %v610_v20, %v611_v22 }
 0x1e1   :  { %v603_v60 = vmin.f32 %v601_v46, %v602_v23  ;;  %v613_v3 = vrot.slane %v612_v24, 4 }
 0x1e3   :  { %v604_v59 = vrot.slane %v603_v60, 1  ;;  %v614_v28 = vmin.f32 %v612_v24, %v613_v3 }
 0x1e5   :  { %v605_v29 = vmin.f32 %v603_v60, %v604_v59  ;;  %v615_v9 = vrot.slane %v614_v28, 2 }
 0x1e7   :  { %vm619_vm0 = vcmp.eq.f32.partialorder %v577_v21, %v605_v29  ;;  %vm621_vm9 = vcmp.eq.f32.partialorder %v579_v61, %v605_v29  ;;  %vm623_vm10 = vcmp.eq.f32.partialorder %v581_v8, %v605_v29  ;;  %vm625_vm11 = vcmp.eq.f32.partialorder %v583_v1, %v605_v29 }
 0x1e8   :  { %vm627_vm12 = vcmp.eq.f32.partialorder %v585_v5, %v605_v29  ;;  %vm629_vm13 = vcmp.eq.f32.partialorder %v587_v16, %v605_v29  ;;  %v635_v62 = vsel %vm619_vm0, %v1239_v43, 64  ;;  %v637_v56 = vsel %vm621_vm9, %v1242_v7, 64 }
 0x1e9   :  { %v639_v6 = vsel %vm623_vm10, %v1245_v10, 64  ;;  %v641_v27 = vsel %vm625_vm11, %v1248_v12, 64  ;;  %vm631_vm14 = vcmp.eq.f32.partialorder %v589_v30, %v605_v29  ;;  %vm633_vm15 = vcmp.eq.f32.partialorder %v591_v2, %v605_v29 }
 0x1ea   :  { %vm651_vm1 = vcmp.lt.s32.totalorder %v635_v62, %v639_v6  ;;  %vm653_vm2 = vcmp.lt.s32.totalorder %v637_v56, %v641_v27  ;;  %v616_v44 = vmin.f32 %v614_v28, %v615_v9  ;;  %v643_v21 = vsel %vm627_vm12, %v1251_v13, 64 }
 0x1eb   :  { %v645_v8 = vsel %vm629_vm13, %v1254_v17, 64  ;;  %v652_v1 = vsel %vm651_vm1, %v635_v62, %v639_v6  ;;  %v654_v61 = vsel %vm653_vm2, %v637_v56, %v641_v27  ;;  %v647_v16 = vsel %vm631_vm14, %v1257_v25, 64 }
 0x1ec   :  { %vm655_vm4 = vcmp.lt.s32.totalorder %v652_v1, %v643_v21  ;;  %vm657_vm5 = vcmp.lt.s32.totalorder %v654_v61, %v645_v8  ;;  %v617_v5 = vrot.slane %v616_v44, 1  ;;  %v649_v47 = vsel %vm633_vm15, %v1260_v26, 64 }
 0x1ed   :  { %v656_v18 = vsel %vm655_vm4, %v652_v1, %v643_v21  ;;  %v658_v36 = vsel %vm657_vm5, %v654_v61, %v645_v8 }
 0x1ee   :  { %vm659_vm6 = vcmp.lt.s32.totalorder %v656_v18, %v647_v16  ;;  %vm661_vm7 = vcmp.lt.s32.totalorder %v658_v36, %v649_v47  ;;  %v618_v30 = vmin.f32 %v616_v44, %v617_v5 }
 0x1ef   :  { %v660_v2 = vsel %vm659_vm6, %v656_v18, %v647_v16  ;;  %v662_v41 = vsel %vm661_vm7, %v658_v36, %v649_v47  ;;  %v478_v16 = vrot.slane %v1472_v55, 4 }
 0x1f0   :  { %vm663_vm8 = vcmp.lt.s32.totalorder %v660_v2, %v662_v41  ;;  %vm620_vm0 = vcmp.eq.f32.partialorder %v1489_v4, %v618_v30  ;;  %vm622_vm9 = vcmp.eq.f32.partialorder %v1492_v53, %v618_v30  ;;  %vm624_vm10 = vcmp.eq.f32.partialorder %v1483_v31, %v618_v30 }
 0x1f1   :  { %v664_v35 = vsel %vm663_vm8, %v660_v2, %v662_v41  ;;  %vm626_vm11 = vcmp.eq.f32.partialorder %v1486_v32, %v618_v30  ;;  %vm628_vm12 = vcmp.eq.f32.partialorder %v1495_v11, %v618_v30  ;;  %v636_v40 = vsel %vm620_vm0, %v1239_v43, 64 }
 0x1f2   :  { %v665_v63 = vrot.slane %v664_v35, 4  ;;  %vm630_vm13 = vcmp.eq.f32.partialorder %v1498_v0, %v618_v30  ;;  %v638_v37 = vsel %vm622_vm9, %v1242_v7, 64  ;;  %v640_v46 = vsel %vm624_vm10, %v1245_v10, 64 }
 0x1f3   :  { %v642_v4 = vsel %vm626_vm11, %v1248_v12, 64  ;;  %vm632_vm15 = vcmp.eq.f32.partialorder %v1505_v15, %v618_v30  ;;  %vm634_vm1 = vcmp.eq.f32.partialorder %v1510_v14, %v618_v30  ;;  %v644_v32 = vsel %vm628_vm12, %v1251_v13, 64 }
 0x1f4   :  { %vm666_vm14 = vcmp.lt.s32.totalorder %v664_v35, %v665_v63  ;;  %vm674_vm2 = vcmp.lt.s32.totalorder %v636_v40, %v640_v46  ;;  %vm676_vm4 = vcmp.lt.s32.totalorder %v638_v37, %v642_v4  ;;  %v646_v11 = vsel %vm630_vm13, %v1254_v17, 64 }
 0x1f5   :  { %v667_v31 = vsel %vm666_vm14, %v664_v35, %v665_v63  ;;  %v675_v0 = vsel %vm674_vm2, %v636_v40, %v640_v46  ;;  %v677_v20 = vsel %vm676_vm4, %v638_v37, %v642_v4  ;;  %v648_v22 = vsel %vm632_vm15, %v1257_v25, 64 }
 0x1f6   :  { %v668_v53 = vrot.slane %v667_v31, 2  ;;  %vm678_vm5 = vcmp.lt.s32.totalorder %v675_v0, %v644_v32  ;;  %vm680_vm6 = vcmp.lt.s32.totalorder %v677_v20, %v646_v11  ;;  %v650_v23 = vsel %vm634_vm1, %v1260_v26, 64 }
 0x1f7   :  { %v679_v15 = vsel %vm678_vm5, %v675_v0, %v644_v32  ;;  %v681_v24 = vsel %vm680_vm6, %v677_v20, %v646_v11 }
 0x1f8   :  { %vm669_vm7 = vcmp.lt.s32.totalorder %v667_v31, %v668_v53  ;;  %vm682_vm8 = vcmp.lt.s32.totalorder %v679_v15, %v648_v22  ;;  %vm684_vm0 = vcmp.lt.s32.totalorder %v681_v24, %v650_v23 }
 0x1f9   :  { %v670_v14 = vsel %vm669_vm7, %v667_v31, %v668_v53  ;;  %v683_v3 = vsel %vm682_vm8, %v679_v15, %v648_v22  ;;  %v685_v59 = vsel %vm684_vm0, %v681_v24, %v650_v23 }
 0x1fa   :  { %v671_v60 = vrot.slane %v670_v14, 1  ;;  %vm686_vm9 = vcmp.lt.s32.totalorder %v683_v3, %v685_v59 }
 0x1fb   :  { %v687_v28 = vsel %vm686_vm9, %v683_v3, %v685_v59 }
 0x1fc   :  { %vm672_vm10 = vcmp.lt.s32.totalorder %v670_v14, %v671_v60  ;;  %v688_v9 = vrot.slane %v687_v28, 4 }
 0x1fd   :  { %v673_v29 = vsel %vm672_vm10, %v670_v14, %v671_v60 }
 0x1fe   :  { %vm711_vm11 = vcmp.eq.s32.totalorder %v1260_v26, %v673_v29  ;;  %vm689_vm12 = vcmp.lt.s32.totalorder %v687_v28, %v688_v9  ;;  %vm709_vm13 = vcmp.eq.s32.totalorder %v1257_v25, %v673_v29  ;;  %vm707_vm14 = vcmp.eq.s32.totalorder %v1254_v17, %v673_v29 }
 0x1ff   :  { %963 = vmatpush.msk.msrb.mxu0 %vm711_vm11, %v1001_v51  ;;  %v690_v62 = vsel %vm689_vm12, %v687_v28, %v688_v9  ;;  %vm705_vm1 = vcmp.eq.s32.totalorder %v1251_v13, %v673_v29  ;;  %vm703_vm2 = vcmp.eq.s32.totalorder %v1248_v12, %v673_v29  ;;  %vm701_vm5 = vcmp.eq.s32.totalorder %v1245_v10, %v673_v29 }
 0x200   :  { %v691_v56 = vrot.slane %v690_v62, 2  ;;  %vm699_vm7 = vcmp.eq.s32.totalorder %v1242_v7, %v673_v29  ;;  %vm697_vm0 = vcmp.eq.s32.totalorder %v1239_v43, %v673_v29 }
 0x201   :  { %964 = vmatpush.msk.msrb.mxu0 %vm709_vm13, %v1001_v51 }
 0x202   :  { %vm692_vm15 = vcmp.lt.s32.totalorder %v690_v62, %v691_v56 }
 0x203   :  { %965 = vmatpush.msk.msrb.mxu0 %vm707_vm14, %v1001_v51  ;;  %v693_v6 = vsel %vm692_vm15, %v690_v62, %v691_v56  ;;  %vm856_vm15 = vcmp.lt.s32.totalorder %v39_v33, 256 }
 0x204   :  { %v694_v27 = vrot.slane %v693_v6, 1 }
 0x205   :  { %966 = vmatpush.msk.msrb.mxu0 %vm705_vm1, %v1001_v51 }
 0x206   :  { %vm695_vm4 = vcmp.lt.s32.totalorder %v693_v6, %v694_v27 }
 0x207   :  { %967 = vmatpush.msk.msrb.mxu0 %vm703_vm2, %v1001_v51  ;;  %v696_v44 = vsel %vm695_vm4, %v693_v6, %v694_v27 }
 0x208   :  { %vm712_vm6 = vcmp.eq.s32.totalorder %v1260_v26, %v696_v44  ;;  %vm710_vm8 = vcmp.eq.s32.totalorder %v1257_v25, %v696_v44  ;;  %vm708_vm9 = vcmp.eq.s32.totalorder %v1254_v17, %v696_v44  ;;  %vm706_vm10 = vcmp.eq.s32.totalorder %v1251_v13, %v696_v44 }
 0x209   :  { %968 = vmatpush.msk.msrb.mxu0 %vm701_vm5, %v1001_v51  ;;  %975 = vmatpush.msk.msrb.mxu1 %vm712_vm6, %v1001_v51  ;;  %vm704_vm11 = vcmp.eq.s32.totalorder %v1248_v12, %v696_v44  ;;  %vm702_vm12 = vcmp.eq.s32.totalorder %v1245_v10, %v696_v44  ;;  %vm700_vm13 = vcmp.eq.s32.totalorder %v1242_v7, %v696_v44 }
 0x20a   :  { %vm698_vm14 = vcmp.eq.s32.totalorder %v1239_v43, %v696_v44 }
 0x20b   :  { %969 = vmatpush.msk.msrb.mxu0 %vm699_vm7, %v1001_v51  ;;  %976 = vmatpush.msk.msrb.mxu1 %vm710_vm8, %v1001_v51 }
 0x20d   :  { %970 = vmatpush.msk.msrb.mxu0 %vm697_vm0, %v1001_v51  ;;  %977 = vmatpush.msk.msrb.mxu1 %vm708_vm9, %v1001_v51 }
 0x20e   :  { %971 = vmatmul.msk.f32.vlgmr.msrb.gmra.mxu0 %vm371_vm3, %v1314_v19 }
 0x20f   :  { %978 = vmatpush.msk.msrb.mxu1 %vm706_vm10, %v1001_v51 }
 0x211   :  { %979 = vmatpush.msk.msrb.mxu1 %vm704_vm11, %v1001_v51 }
 0x213   :  { %980 = vmatpush.msk.msrb.mxu1 %vm702_vm12, %v1001_v51 }
 0x215   :  { %981 = vmatpush.msk.msrb.mxu1 %vm700_vm13, %v1001_v51 }
 0x216   :  { %972 = vmatmul.msk.f32.gmra.mxu0 %vm371_vm3, %v1353_v45 }
 0x217   :  { %982 = vmatpush.msk.msrb.mxu1 %vm698_vm14, %v1001_v51 }
 0x218   :  { %983 = vmatmul.msk.f32.vlgmr.msrb.gmra.mxu1 %vm371_vm3, %v1314_v19 }
 0x21e   :  { %973 = vmatmul.msk.f32.gmra.mxu0 %vm371_vm3, %v1388_v57 }
 0x220   :  { %984 = vmatmul.msk.f32.gmra.mxu1 %vm371_vm3, %v1353_v45 }
 0x226   :  { %974 = vmatmul.msk.f32.gmra.mxu0 %vm371_vm3, %v1398_v58 }
 0x228   :  { %985 = vmatmul.msk.f32.gmra.mxu1 %vm371_vm3, %v1388_v57 }
 0x230   :  { %986 = vmatmul.msk.f32.gmra.mxu1 %vm371_vm3, %v1398_v58  ;;  %vm851_vm3 = vcmask 1040384  }
 0x28b   :  { %v762_v43 = vpop.f32.mrf.mxu0 }
 0x28c   :  { %987 = vst [vmem:[%s1630_s4 + $0x40] sm:$0xff] %v762_v43  ;;  %v812_v17 = vsub.f32 %v762_v43, %v1347_v38 }
 0x28e   :  { %v820_v19 = vmul.f32 %v812_v17, %v812_v17 }
 0x293   :  { %v765_v7 = vpop.f32.mrf.mxu0 }
 0x294   :  { %989 = vst [vmem:[%s1630_s4 + $0x50] sm:$0xff] %v765_v7  ;;  %v814_v13 = vsub.f32 %v765_v7, %v1339_v54 }
 0x295   :  { %v791_v10 = vpop.f32.mrf.mxu1 }
 0x296   :  { %988 = vst [vmem:[%s1630_s4 + $0x48] sm:$0xff] %v791_v10  ;;  %v822_v51 = vmul.f32 %v814_v13, %v814_v13  ;;  %v813_v61 = vsub.f32 %v791_v10, %v1382_v42 }
 0x298   :  { %v828_v58 = vadd.f32 %v822_v51, %v820_v19  ;;  %v821_v36 = vmul.f32 %v813_v61, %v813_v61 }
 0x29b   :  { %v768_v12 = vpop.f32.mrf.mxu0 }
 0x29c   :  { %991 = vst [vmem:[%s1630_s4 + $0x60] sm:$0xff] %v768_v12  ;;  %v816_v26 = vsub.f32 %v768_v12, %v1331_v34 }
 0x29d   :  { %v794_v25 = vpop.f32.mrf.mxu1 }
 0x29e   :  { %990 = vst [vmem:[%s1630_s4 + $0x58] sm:$0xff] %v794_v25  ;;  %v824_v45 = vmul.f32 %v816_v26, %v816_v26  ;;  %v815_v34 = vsub.f32 %v794_v25, %v1376_v39  ;;  %v479_v39 = vadd.f32 %v478_v16, %v1472_v55 }
 0x2a0   :  { %v829_v21 = vadd.f32 %v828_v58, %v824_v45  ;;  %v823_v47 = vmul.f32 %v815_v34, %v815_v34  ;;  %v480_v37 = vrot.slane %v479_v39, 2 }
 0x2a2   :  { %v837_v41 = vadd.f32 %v823_v47, %v821_v36  ;;  %v481_v53 = vadd.f32 %v480_v37, %v479_v39 }
 0x2a3   :  { %v771_v57 = vpop.f32.mrf.mxu0 }
 0x2a4   :  { %993 = vst [vmem:[%s1630_s4 + $0x70] sm:$0xff] %v771_v57  ;;  %v818_v54 = vsub.f32 %v771_v57, %v1323_v50  ;;  %v469_v50 = vrot.slane %v1466_v49, 4  ;;  %v482_v22 = vrot.slane %v481_v53, 1 }
 0x2a5   :  { %v797_v38 = vpop.f32.mrf.mxu1 }
 0x2a6   :  { %v826_v8 = vmul.f32 %v818_v54, %v818_v54  ;;  %992 = vst [vmem:[%s1630_s4 + $0x68] sm:$0xff] %v797_v38  ;;  %v817_v5 = vsub.f32 %v797_v38, %v1367_v52  ;;  %v470_v52 = vadd.f32 %v469_v50, %v1466_v49 }
 0x2a8   :  { %v830_v1 = vadd.f32 %v829_v21, %v826_v8  ;;  %v825_v30 = vmul.f32 %v817_v5, %v817_v5  ;;  %v471_v31 = vrot.slane %v470_v52, 2 }
 0x2aa   :  { %v831_v18 = vrot.slane %v830_v1, 4  ;;  %v838_v63 = vadd.f32 %v837_v41, %v825_v30  ;;  %v472_v0 = vadd.f32 %v471_v31, %v470_v52 }
 0x2ac   :  { %v832_v35 = vadd.f32 %v831_v18, %v830_v1  ;;  %v473_v24 = vrot.slane %v472_v0, 1 }
 0x2ad   :  { %v800_v2 = vpop.f32.mrf.mxu1 }
 0x2ae   :  { %994 = vst [vmem:[%s1630_s4 + $0x78] sm:$0xff] %v800_v2  ;;  %v819_v42 = vsub.f32 %v800_v2, %v1358_v48  ;;  %v833_v46 = vrot.slane %v832_v35, 2  ;;  %v483_v48 = vadd.f32 %v482_v22, %v481_v53  ;;  %v474_v3 = vadd.f32 %v473_v24, %v472_v0 }
 0x2b0   :  { %v827_v40 = vmul.f32 %v819_v42, %v819_v42  ;;  %v834_v11 = vadd.f32 %v833_v46, %v832_v35 }
 0x2b2   :  { %v839_v4 = vadd.f32 %v838_v63, %v827_v40  ;;  %v835_v23 = vrot.slane %v834_v11, 1 }
 0x2b4   :  { %v840_v32 = vrot.slane %v839_v4, 4  ;;  %v836_v60 = vadd.f32 %v835_v23, %v834_v11 }
 0x2b6   :  { %v841_v55 = vadd.f32 %v840_v32, %v839_v4  ;;  %v846_v28 = vadd.f32 %v836_v60, %v474_v3 }
 0x2b8   :  { %v842_v20 = vrot.slane %v841_v55, 2 }
 0x2ba   :  { %v843_v15 = vadd.f32 %v842_v20, %v841_v55 }
 0x2bc   :  { %v844_v14 = vrot.slane %v843_v15, 1 }
 0x2be   :  { %v845_v49 = vadd.f32 %v844_v14, %v843_v15 }
 0x2c0   :  { %v847_v59 = vadd.f32 %v845_v49, %v483_v48 }
 0x2c2   :  { %v850_v29 = vrot.slane %v847_v59, 7 }
 0x2c4   :  { %v852_v9 = vsel %vm851_vm3, %v846_v28, %v850_v29 }
 0x2c5   :  { %858 = vst.msk [vmem:[%s1631_s5] sm:$0x3] %vm856_vm15, %v852_v9 }

// kernel: _vq_forward_impl.1
= control target key start
LH: loop header
LB: loop body
LE: loop exit
PB: predicated region body
PF: predicated region fallthrough
CT: control target
= control target key end

     0   :  { %v1000_v3 = vmov 0   ;;  %vm56_vm0 = vcmask 261120   ;;  %s1626_s0 = inlined_call_operand.vmem [shape: f32[2,32,256], index: 0, kind: input, shape index: {}]   ;;  %s1627_s3 = inlined_call_operand.vmem [shape: f32[64,1], index: 3, kind: input, shape index: {}]   ;;  %s1628_s1 = inlined_call_operand.vmem [shape: f32[64,32], index: 1, kind: input, shape index: {}]   ;;  %s1629_s2 = inlined_call_operand.vmem [shape: f32[32,64], index: 2, kind: input, shape index: {}]   ;;  %s1630_s4 = inlined_call_operand.vmem [shape: f32[2,32,256], index: 4, kind: output, shape index: {0}]   ;;  %s1631_s5 = inlined_call_operand.vmem [shape: f32[1,1,1,256], index: 5, kind: output, shape index: {1}]  }
   0x1   :  { %v1035_v0 = vld [vmem:[%s1626_s0 + $0x30] sm:$0xff]  ;;  %v1040_v1 = vld [vmem:[%s1626_s0 + $0x38] sm:$0xff]  ;;  %v1045_v2 = vld [vmem:[%s1626_s0 + $0x20] sm:$0xff]  ;;  %997 = vset.pattern.permute.xlu0 %v1000_v3  ;;  %998 = vset.pattern.permute.xlu1 %v1000_v3 }
   0x2   :  { %93 = vmatpush.msra.mxu0 %v1035_v0  ;;  %134 = vmatpush.msra.mxu1 %v1040_v1  ;;  %v1052_v4 = vld [vmem:[%s1626_s0 + $0x28] sm:$0xff]  ;;  %v1057_v5 = vld [vmem:[%s1626_s0 + $0x10] sm:$0xff]  ;;  %v1062_v6 = vld [vmem:[%s1626_s0 + $0x18] sm:$0xff] }
   0x3   :  { %999 = vset.pattern.permute.xlu2 %v1000_v3  ;;  %v31_v7 = vld [vmem:[%s1627_s3] sm:$0xff]  ;;  %v1077_v9 = vld [vmem:[%s1626_s0 + $0x8] sm:$0xff]  ;;  %v33_v10 = vld [vmem:[%s1627_s3 + $0x10] sm:$0xff] }
   0x4   :  { %94 = vmatpush.msra.mxu0 %v1045_v2  ;;  %135 = vmatpush.msra.mxu1 %v1052_v4  ;;  %v1072_v8 = vld [vmem:[%s1626_s0] sm:$0xff]  ;;  %v32_v12 = vld [vmem:[%s1627_s3 + $0x8] sm:$0xff]  ;;  %v34_v13 = vld [vmem:[%s1627_s3 + $0x18] sm:$0xff] }
   0x5   :  { %165 = vperm.xlu0 %997, %v31_v7   ;;  %v1087_v11 = vld [vmem:[%s1628_s1] sm:$0xff]  ;;  %175 = vperm.xlu1 %998, %v33_v10   ;;  %v1104_v14 = vld [vmem:[%s1628_s1 + $0x8] sm:$0xff]  ;;  %v1113_v15 = vld [vmem:[%s1628_s1 + $0x10] sm:$0xff] }
   0x6   :  { %95 = vmatpush.msra.mxu0 %v1057_v5  ;;  %136 = vmatpush.msra.mxu1 %v1062_v6  ;;  %v38_v16 = vld [vmem:[%s1627_s3 + $0x38] sm:$0xff]  ;;  %v37_v17 = vld [vmem:[%s1627_s3 + $0x30] sm:$0xff]  ;;  %v35_v19 = vld [vmem:[%s1627_s3 + $0x20] sm:$0xff] }
   0x7   :  { %v1128_v18 = vld [vmem:[%s1628_s1 + $0x18] sm:$0xff]  ;;  %185 = vperm.xlu2 %999, %v35_v19   ;;  %v1140_v20 = vld [vmem:[%s1628_s1 + $0x20] sm:$0xff]  ;;  %v36_v21 = vld [vmem:[%s1627_s3 + $0x28] sm:$0xff] }
   0x8   :  { %96 = vmatpush.msra.mxu0 %v1072_v8  ;;  %137 = vmatpush.msra.mxu1 %v1077_v9  ;;  %v1152_v22 = vld [vmem:[%s1628_s1 + $0x28] sm:$0xff]  ;;  %v1161_v23 = vld [vmem:[%s1628_s1 + $0x30] sm:$0xff]  ;;  %v1170_v24 = vld [vmem:[%s1628_s1 + $0x38] sm:$0xff] }
   0x9   :  { %867 = vmatmul.msk.f32.vlgmr.msra.gmra.mxu0 %vm56_vm0, %v1087_v11  ;;  %875 = vmatmul.msk.f32.vlgmr.msra.gmra.mxu1 %vm56_vm0, %v1087_v11 }
   0xd   :  { %170 = vperm.xlu0 %997, %v32_v12   ;;  %180 = vperm.xlu1 %998, %v34_v13  }
   0xf   :  { %190 = vperm.xlu2 %999, %v36_v21  }
  0x11   :  { %868 = vmatmul.msk.f32.gmra.mxu0 %vm56_vm0, %v1104_v14  ;;  %876 = vmatmul.msk.f32.gmra.mxu1 %vm56_vm0, %v1104_v14 }
  0x15   :  { %200 = vperm.xlu1 %998, %v38_v16   ;;  %195 = vperm.xlu0 %997, %v37_v17  }
  0x19   :  { %869 = vmatmul.msk.f32.gmra.mxu0 %vm56_vm0, %v1113_v15  ;;  %877 = vmatmul.msk.f32.gmra.mxu1 %vm56_vm0, %v1113_v15 }
  0x21   :  { %870 = vmatmul.msk.f32.gmra.mxu0 %vm56_vm0, %v1128_v18  ;;  %878 = vmatmul.msk.f32.gmra.mxu1 %vm56_vm0, %v1128_v18 }
  0x29   :  { %871 = vmatmul.msk.f32.gmra.mxu0 %vm56_vm0, %v1140_v20  ;;  %879 = vmatmul.msk.f32.gmra.mxu1 %vm56_vm0, %v1140_v20 }
  0x31   :  { %872 = vmatmul.msk.f32.gmra.mxu0 %vm56_vm0, %v1152_v22  ;;  %880 = vmatmul.msk.f32.gmra.mxu1 %vm56_vm0, %v1152_v22 }
  0x39   :  { %873 = vmatmul.msk.f32.gmra.mxu0 %vm56_vm0, %v1161_v23  ;;  %881 = vmatmul.msk.f32.gmra.mxu1 %vm56_vm0, %v1161_v23 }
  0x41   :  { %874 = vmatmul.msk.f32.gmra.mxu0 %vm56_vm0, %v1170_v24  ;;  %882 = vmatmul.msk.f32.gmra.mxu1 %vm56_vm0, %v1170_v24 }
  0x61   :  { %v1180_v37 = vpop.permute.xlu2 %185 }
  0x69   :  { %v1192_v46 = vpop.permute.xlu2 %190 }
  0x77   :  { %v1176_v35 = vpop.permute.xlu0 %165  ;;  %v1178_v36 = vpop.permute.xlu1 %175 }
  0x7f   :  { %v1182_v40 = vpop.permute.xlu0 %170  ;;  %v1184_v41 = vpop.permute.xlu1 %180 }
  0x86   :  { %v98_v25 = vpop.f32.mrf.mxu0  ;;  %v139_v26 = vpop.f32.mrf.mxu1 }
  0x87   :  { %v203_v49 = vsub.f32 %v1176_v35, %v98_v25  ;;  %v1202_v50 = vsub.f32 %v1176_v35, %v139_v26  ;;  %v1219_v59 = vpop.permute.xlu0 %195  ;;  %v1224_v62 = vpop.permute.xlu1 %200 }
  0x8e   :  { %v101_v27 = vpop.f32.mrf.mxu0  ;;  %v142_v28 = vpop.f32.mrf.mxu1 }
  0x8f   :  { %v205_v53 = vsub.f32 %v1182_v40, %v101_v27  ;;  %v1210_v54 = vsub.f32 %v1182_v40, %v142_v28 }
  0x96   :  { %v104_v29 = vpop.f32.mrf.mxu0  ;;  %v145_v30 = vpop.f32.mrf.mxu1 }
  0x97   :  { %v1187_v44 = vsub.f32 %v1178_v36, %v104_v29  ;;  %v1190_v45 = vsub.f32 %v1178_v36, %v145_v30 }
  0x99   :  { %v219_v57 = vmin.f32 %v203_v49, %v1187_v44  ;;  %v232_v58 = vmin.f32 %v1202_v50, %v1190_v45 }
  0x9e   :  { %v107_v31 = vpop.f32.mrf.mxu0  ;;  %v148_v32 = vpop.f32.mrf.mxu1 }
  0x9f   :  { %v1195_v47 = vsub.f32 %v1184_v41, %v107_v31  ;;  %v1198_v48 = vsub.f32 %v1184_v41, %v148_v32 }
  0xa1   :  { %v220_v60 = vmin.f32 %v205_v53, %v1195_v47  ;;  %v233_v61 = vmin.f32 %v1210_v54, %v1198_v48 }
  0xa6   :  { %v110_v33 = vpop.f32.mrf.mxu0  ;;  %v151_v34 = vpop.f32.mrf.mxu1 }
  0xa7   :  { %v211_v51 = vsub.f32 %v1180_v37, %v110_v33  ;;  %v1206_v52 = vsub.f32 %v1180_v37, %v151_v34  ;;  %v39_v33 = vlaneseq }
  0xa9   :  { %v221_v7 = vmin.f32 %v219_v57, %v211_v51  ;;  %v234_v10 = vmin.f32 %v232_v58, %v1206_v52 }
  0xae   :  { %v113_v38 = vpop.f32.mrf.mxu0  ;;  %v154_v39 = vpop.f32.mrf.mxu1 }
  0xaf   :  { %v213_v55 = vsub.f32 %v1192_v46, %v113_v38  ;;  %v1214_v56 = vsub.f32 %v1192_v46, %v154_v39 }
  0xb1   :  { %v222_v16 = vmin.f32 %v220_v60, %v213_v55  ;;  %v235_v17 = vmin.f32 %v233_v61, %v1214_v56 }
  0xb6   :  { %v116_v42 = vpop.f32.mrf.mxu0  ;;  %v157_v43 = vpop.f32.mrf.mxu1 }
  0xb7   :  { %v215_v63 = vsub.f32 %v1219_v59, %v116_v42  ;;  %v1228_v3 = vsub.f32 %v1219_v59, %v157_v43  ;;  %v1239_v43 = vshrl.u32 %v39_v33, 7 }
  0xb9   :  { %v223_v25 = vmin.f32 %v221_v7, %v215_v63  ;;  %v236_v26 = vmin.f32 %v234_v10, %v1228_v3  ;;  %v1242_v7 = vadd.s32 8, %v1239_v43  ;;  %v1245_v10 = vadd.s32 16, %v1239_v43 }
  0xbe   :  { %v119_v12 = vpop.f32.mrf.mxu0  ;;  %v160_v13 = vpop.f32.mrf.mxu1 }
  0xbf   :  { %v217_v19 = vsub.f32 %v1224_v62, %v119_v12  ;;  %v1234_v21 = vsub.f32 %v1224_v62, %v160_v13  ;;  %v1248_v12 = vadd.s32 24, %v1239_v43  ;;  %v1251_v13 = vadd.s32 32, %v1239_v43 }
  0xc1   :  { %v224_v27 = vmin.f32 %v222_v16, %v217_v19  ;;  %v237_v28 = vmin.f32 %v235_v17, %v1234_v21  ;;  %v1254_v17 = vadd.s32 40, %v1239_v43 }
  0xc3   :  { %v225_v29 = vmin.f32 %v223_v25, %v224_v27  ;;  %v238_v30 = vmin.f32 %v236_v26, %v237_v28  ;;  %v1257_v25 = vadd.s32 48, %v1239_v43  ;;  %v1260_v26 = vadd.s32 56, %v1239_v43 }
  0xc5   :  { %v226_v31 = vrot.slane %v225_v29, 4  ;;  %v239_v32 = vrot.slane %v238_v30, 4 }
  0xc7   :  { %v227_v34 = vmin.f32 %v225_v29, %v226_v31  ;;  %v240_v38 = vmin.f32 %v238_v30, %v239_v32 }
  0xc9   :  { %v228_v39 = vrot.slane %v227_v34, 2  ;;  %v241_v42 = vrot.slane %v240_v38, 2 }
  0xcb   :  { %v229_v57 = vmin.f32 %v227_v34, %v228_v39  ;;  %v242_v58 = vmin.f32 %v240_v38, %v241_v42 }
  0xcd   :  { %v230_v60 = vrot.slane %v229_v57, 1  ;;  %v243_v61 = vrot.slane %v242_v58, 1 }
  0xcf   :  { %v231_v16 = vmin.f32 %v229_v57, %v230_v60  ;;  %v244_v27 = vmin.f32 %v242_v58, %v243_v61 }
  0xd1   :  { %vm245_vm1 = vcmp.eq.f32.partialorder %v203_v49, %v231_v16  ;;  %vm247_vm2 = vcmp.eq.f32.partialorder %v205_v53, %v231_v16  ;;  %vm249_vm3 = vcmp.eq.f32.partialorder %v1187_v44, %v231_v16  ;;  %vm251_vm4 = vcmp.eq.f32.partialorder %v1195_v47, %v231_v16 }
  0xd2   :  { %vm253_vm5 = vcmp.eq.f32.partialorder %v211_v51, %v231_v16  ;;  %vm255_vm6 = vcmp.eq.f32.partialorder %v213_v55, %v231_v16  ;;  %vm257_vm7 = vcmp.eq.f32.partialorder %v215_v63, %v231_v16  ;;  %vm259_vm8 = vcmp.eq.f32.partialorder %v217_v19, %v231_v16 }
  0xd3   :  { %v261_v28 = vsel %vm245_vm1, %v1239_v43, 64  ;;  %v263_v29 = vsel %vm247_vm2, %v1242_v7, 64  ;;  %v265_v30 = vsel %vm249_vm3, %v1245_v10, 64  ;;  %v267_v31 = vsel %vm251_vm4, %v1248_v12, 64 }
  0xd4   :  { %v269_v32 = vsel %vm253_vm5, %v1251_v13, 64  ;;  %v271_v49 = vsel %vm255_vm6, %v1254_v17, 64  ;;  %v273_v44 = vsel %vm257_vm7, %v1257_v25, 64  ;;  %v275_v47 = vsel %vm259_vm8, %v1260_v26, 64 }
  0xd5   :  { %vm277_vm9 = vcmp.lt.s32.totalorder %v261_v28, %v265_v30  ;;  %vm279_vm10 = vcmp.lt.s32.totalorder %v263_v29, %v267_v31  ;;  %vm246_vm11 = vcmp.eq.f32.partialorder %v1202_v50, %v244_v27  ;;  %vm248_vm12 = vcmp.eq.f32.partialorder %v1210_v54, %v244_v27 }
  0xd6   :  { %v278_v51 = vsel %vm277_vm9, %v261_v28, %v265_v30  ;;  %v280_v53 = vsel %vm279_vm10, %v263_v29, %v267_v31  ;;  %vm250_vm15 = vcmp.eq.f32.partialorder %v1190_v45, %v244_v27  ;;  %vm252_vm1 = vcmp.eq.f32.partialorder %v1198_v48, %v244_v27 }
  0xd7   :  { %vm281_vm13 = vcmp.lt.s32.totalorder %v278_v51, %v269_v32  ;;  %vm283_vm14 = vcmp.lt.s32.totalorder %v280_v53, %v271_v49  ;;  %vm254_vm2 = vcmp.eq.f32.partialorder %v1206_v52, %v244_v27  ;;  %vm256_vm3 = vcmp.eq.f32.partialorder %v1214_v56, %v244_v27 }
  0xd8   :  { %v282_v55 = vsel %vm281_vm13, %v278_v51, %v269_v32  ;;  %v284_v63 = vsel %vm283_vm14, %v280_v53, %v271_v49  ;;  %v262_v19 = vsel %vm246_vm11, %v1239_v43, 64  ;;  %v264_v50 = vsel %vm248_vm12, %v1242_v7, 64 }
  0xd9   :  { %vm285_vm4 = vcmp.lt.s32.totalorder %v282_v55, %v273_v44  ;;  %vm287_vm5 = vcmp.lt.s32.totalorder %v284_v63, %v275_v47  ;;  %v266_v38 = vsel %vm250_vm15, %v1245_v10, 64  ;;  %v268_v45 = vsel %vm252_vm1, %v1248_v12, 64 }
  0xda   :  { %v286_v34 = vsel %vm285_vm4, %v282_v55, %v273_v44  ;;  %v288_v54 = vsel %vm287_vm5, %v284_v63, %v275_v47  ;;  %vm258_vm7 = vcmp.eq.f32.partialorder %v1228_v3, %v244_v27  ;;  %vm260_vm8 = vcmp.eq.f32.partialorder %v1234_v21, %v244_v27 }
  0xdb   :  { %vm289_vm6 = vcmp.lt.s32.totalorder %v286_v34, %v288_v54  ;;  %v270_v52 = vsel %vm254_vm2, %v1251_v13, 64  ;;  %vm300_vm9 = vcmp.lt.s32.totalorder %v262_v19, %v266_v38  ;;  %vm302_vm10 = vcmp.lt.s32.totalorder %v264_v50, %v268_v45 }
  0xdc   :  { %v290_v48 = vsel %vm289_vm6, %v286_v34, %v288_v54  ;;  %v272_v42 = vsel %vm256_vm3, %v1254_v17, 64  ;;  %v301_v57 = vsel %vm300_vm9, %v262_v19, %v266_v38  ;;  %v303_v58 = vsel %vm302_vm10, %v264_v50, %v268_v45  ;;  %v1314_v19 = vld [vmem:[%s1629_s2] sm:$0xff]  ;;  %v1323_v50 = vld [vmem:[%s1626_s0 + $0x70] sm:$0xff]  ;;  %v1353_v45 = vld [vmem:[%s1629_s2 + $0x8] sm:$0xff] }
  0xdd   :  { %v291_v39 = vrot.slane %v290_v48, 4  ;;  %v274_v60 = vsel %vm258_vm7, %v1257_v25, 64  ;;  %vm304_vm11 = vcmp.lt.s32.totalorder %v301_v57, %v270_v52  ;;  %vm306_vm12 = vcmp.lt.s32.totalorder %v303_v58, %v272_v42  ;;  %v1331_v34 = vld [vmem:[%s1626_s0 + $0x60] sm:$0xff]  ;;  %v1339_v54 = vld [vmem:[%s1626_s0 + $0x50] sm:$0xff] }
  0xde   :  { %v276_v3 = vsel %vm260_vm8, %v1260_v26, 64  ;;  %v305_v21 = vsel %vm304_vm11, %v301_v57, %v270_v52  ;;  %v307_v61 = vsel %vm306_vm12, %v303_v58, %v272_v42  ;;  %v1001_v51 = vmov 1.0   ;;  %v1347_v38 = vld [vmem:[%s1626_s0 + $0x40] sm:$0xff]  ;;  %v1367_v52 = vld [vmem:[%s1626_s0 + $0x68] sm:$0xff]  ;;  %v1388_v57 = vld [vmem:[%s1629_s2 + $0x10] sm:$0xff] }
  0xdf   :  { %vm292_vm13 = vcmp.lt.s32.totalorder %v290_v48, %v291_v39  ;;  %vm308_vm14 = vcmp.lt.s32.totalorder %v305_v21, %v274_v60  ;;  %vm310_vm15 = vcmp.lt.s32.totalorder %v307_v61, %v276_v3  ;;  %v1382_v42 = vld [vmem:[%s1626_s0 + $0x48] sm:$0xff]  ;;  %v1398_v58 = vld [vmem:[%s1629_s2 + $0x18] sm:$0xff] }
  0xe0   :  { %v293_v16 = vsel %vm292_vm13, %v290_v48, %v291_v39  ;;  %v309_v29 = vsel %vm308_vm14, %v305_v21, %v274_v60  ;;  %v311_v30 = vsel %vm310_vm15, %v307_v61, %v276_v3  ;;  %v1358_v48 = vld [vmem:[%s1626_s0 + $0x78] sm:$0xff] }
  0xe1   :  { %v294_v28 = vrot.slane %v293_v16, 2  ;;  %vm312_vm1 = vcmp.lt.s32.totalorder %v309_v29, %v311_v30  ;;  %v1376_v39 = vld [vmem:[%s1626_s0 + $0x58] sm:$0xff] }
  0xe2   :  { %v313_v56 = vsel %vm312_vm1, %v309_v29, %v311_v30 }
  0xe3   :  { %vm295_vm2 = vcmp.lt.s32.totalorder %v293_v16, %v294_v28  ;;  %v314_v31 = vrot.slane %v313_v56, 4 }
  0xe4   :  { %v296_v27 = vsel %vm295_vm2, %v293_v16, %v294_v28 }
  0xe5   :  { %v297_v32 = vrot.slane %v296_v27, 1  ;;  %vm315_vm3 = vcmp.lt.s32.totalorder %v313_v56, %v314_v31 }
  0xe6   :  { %v316_v49 = vsel %vm315_vm3, %v313_v56, %v314_v31  ;;  %vm371_vm3 = vcmask 523264  }
  0xe7   :  { %vm298_vm4 = vcmp.lt.s32.totalorder %v296_v27, %v297_v32  ;;  %v317_v47 = vrot.slane %v316_v49, 2 }
  0xe8   :  { %v299_v44 = vsel %vm298_vm4, %v296_v27, %v297_v32 }
  0xe9   :  { %vm337_vm5 = vcmp.eq.s32.totalorder %v1260_v26, %v299_v44  ;;  %vm318_vm6 = vcmp.lt.s32.totalorder %v316_v49, %v317_v47  ;;  %vm335_vm7 = vcmp.eq.s32.totalorder %v1257_v25, %v299_v44  ;;  %vm333_vm8 = vcmp.eq.s32.totalorder %v1254_v17, %v299_v44 }
  0xea   :  { %899 = vmatpush.msk.msra.mxu2 %vm337_vm5, %v1001_v51  ;;  %v319_v53 = vsel %vm318_vm6, %v316_v49, %v317_v47  ;;  %vm331_vm10 = vcmp.eq.s32.totalorder %v1251_v13, %v299_v44  ;;  %vm329_vm12 = vcmp.eq.s32.totalorder %v1248_v12, %v299_v44  ;;  %vm327_vm14 = vcmp.eq.s32.totalorder %v1245_v10, %v299_v44 }
  0xeb   :  { %v320_v55 = vrot.slane %v319_v53, 1  ;;  %vm325_vm1 = vcmp.eq.s32.totalorder %v1242_v7, %v299_v44  ;;  %vm323_vm4 = vcmp.eq.s32.totalorder %v1239_v43, %v299_v44 }
  0xec   :  { %900 = vmatpush.msk.msra.mxu2 %vm335_vm7, %v1001_v51 }
  0xed   :  { %vm321_vm9 = vcmp.lt.s32.totalorder %v319_v53, %v320_v55 }
  0xee   :  { %901 = vmatpush.msk.msra.mxu2 %vm333_vm8, %v1001_v51  ;;  %v322_v63 = vsel %vm321_vm9, %v319_v53, %v320_v55 }
  0xef   :  { %vm338_vm11 = vcmp.eq.s32.totalorder %v1260_v26, %v322_v63  ;;  %vm336_vm13 = vcmp.eq.s32.totalorder %v1257_v25, %v322_v63  ;;  %vm334_vm15 = vcmp.eq.s32.totalorder %v1254_v17, %v322_v63  ;;  %vm332_vm2 = vcmp.eq.s32.totalorder %v1251_v13, %v322_v63 }
  0xf0   :  { %902 = vmatpush.msk.msra.mxu2 %vm331_vm10, %v1001_v51  ;;  %911 = vmatpush.msk.msra.mxu3 %vm338_vm11, %v1001_v51  ;;  %vm330_vm5 = vcmp.eq.s32.totalorder %v1248_v12, %v322_v63  ;;  %vm328_vm6 = vcmp.eq.s32.totalorder %v1245_v10, %v322_v63  ;;  %vm326_vm7 = vcmp.eq.s32.totalorder %v1242_v7, %v322_v63 }
  0xf1   :  { %vm324_vm8 = vcmp.eq.s32.totalorder %v1239_v43, %v322_v63 }
  0xf2   :  { %903 = vmatpush.msk.msra.mxu2 %vm329_vm12, %v1001_v51  ;;  %912 = vmatpush.msk.msra.mxu3 %vm336_vm13, %v1001_v51 }
  0xf4   :  { %904 = vmatpush.msk.msra.mxu2 %vm327_vm14, %v1001_v51  ;;  %913 = vmatpush.msk.msra.mxu3 %vm334_vm15, %v1001_v51 }
  0xf6   :  { %905 = vmatpush.msk.msra.mxu2 %vm325_vm1, %v1001_v51  ;;  %914 = vmatpush.msk.msra.mxu3 %vm332_vm2, %v1001_v51 }
  0xf8   :  { %906 = vmatpush.msk.msra.mxu2 %vm323_vm4, %v1001_v51  ;;  %915 = vmatpush.msk.msra.mxu3 %vm330_vm5, %v1001_v51 }
  0xf9   :  { %907 = vmatmul.msk.f32.vlgmr.msra.gmra.mxu2 %vm371_vm3, %v1314_v19 }
  0xfa   :  { %507 = vmatpush.msrb.mxu2 %v1323_v50  ;;  %916 = vmatpush.msk.msra.mxu3 %vm328_vm6, %v1001_v51 }
  0xfc   :  { %508 = vmatpush.msrb.mxu2 %v1331_v34  ;;  %917 = vmatpush.msk.msra.mxu3 %vm326_vm7, %v1001_v51 }
  0xfe   :  { %509 = vmatpush.msrb.mxu2 %v1339_v54  ;;  %918 = vmatpush.msk.msra.mxu3 %vm324_vm8, %v1001_v51 }
  0xff   :  { %919 = vmatmul.msk.f32.vlgmr.msra.gmra.mxu3 %vm371_vm3, %v1314_v19 }
 0x100   :  { %510 = vmatpush.msrb.mxu2 %v1347_v38  ;;  %548 = vmatpush.msrb.mxu3 %v1358_v48 }
 0x101   :  { %908 = vmatmul.msk.f32.gmra.mxu2 %vm371_vm3, %v1353_v45 }
 0x102   :  { %549 = vmatpush.msrb.mxu3 %v1367_v52 }
 0x104   :  { %550 = vmatpush.msrb.mxu3 %v1376_v39 }
 0x106   :  { %551 = vmatpush.msrb.mxu3 %v1382_v42 }
 0x107   :  { %920 = vmatmul.msk.f32.gmra.mxu3 %vm371_vm3, %v1353_v45 }
 0x109   :  { %909 = vmatmul.msk.f32.gmra.mxu2 %vm371_vm3, %v1388_v57 }
 0x10f   :  { %921 = vmatmul.msk.f32.gmra.mxu3 %vm371_vm3, %v1388_v57 }
 0x111   :  { %910 = vmatmul.msk.f32.gmra.mxu2 %vm371_vm3, %v1398_v58 }
 0x117   :  { %922 = vmatmul.msk.f32.gmra.mxu3 %vm371_vm3, %v1398_v58 }
 0x119   :  { %931 = vmatmul.msk.f32.vlgmr.msrb.gmra.mxu2 %vm56_vm0, %v1087_v11 }
 0x11f   :  { %939 = vmatmul.msk.f32.vlgmr.msrb.gmra.mxu3 %vm56_vm0, %v1087_v11 }
 0x121   :  { %932 = vmatmul.msk.f32.gmra.mxu2 %vm56_vm0, %v1104_v14 }
 0x127   :  { %940 = vmatmul.msk.f32.gmra.mxu3 %vm56_vm0, %v1104_v14 }
 0x129   :  { %933 = vmatmul.msk.f32.gmra.mxu2 %vm56_vm0, %v1113_v15 }
 0x12f   :  { %941 = vmatmul.msk.f32.gmra.mxu3 %vm56_vm0, %v1113_v15 }
 0x131   :  { %934 = vmatmul.msk.f32.gmra.mxu2 %vm56_vm0, %v1128_v18 }
 0x137   :  { %942 = vmatmul.msk.f32.gmra.mxu3 %vm56_vm0, %v1128_v18 }
 0x139   :  { %935 = vmatmul.msk.f32.gmra.mxu2 %vm56_vm0, %v1140_v20 }
 0x13f   :  { %943 = vmatmul.msk.f32.gmra.mxu3 %vm56_vm0, %v1140_v20 }
 0x141   :  { %936 = vmatmul.msk.f32.gmra.mxu2 %vm56_vm0, %v1152_v22 }
 0x147   :  { %944 = vmatmul.msk.f32.gmra.mxu3 %vm56_vm0, %v1152_v22 }
 0x149   :  { %937 = vmatmul.msk.f32.gmra.mxu2 %vm56_vm0, %v1161_v23 }
 0x14f   :  { %945 = vmatmul.msk.f32.gmra.mxu3 %vm56_vm0, %v1161_v23 }
 0x151   :  { %938 = vmatmul.msk.f32.gmra.mxu2 %vm56_vm0, %v1170_v24 }
 0x157   :  { %946 = vmatmul.msk.f32.gmra.mxu3 %vm56_vm0, %v1170_v24 }
 0x17c   :  { %v401_v11 = vpop.f32.mrf.mxu2 }
 0x17d   :  { %442 = vst [vmem:[%s1630_s4] sm:$0xff] %v401_v11  ;;  %v450_v14 = vsub.f32 %v401_v11, %v1072_v8 }
 0x17f   :  { %v458_v22 = vmul.f32 %v450_v14, %v450_v14 }
 0x182   :  { %v430_v15 = vpop.f32.mrf.mxu3 }
 0x183   :  { %443 = vst [vmem:[%s1630_s4 + $0x8] sm:$0xff] %v430_v15  ;;  %v451_v60 = vsub.f32 %v430_v15, %v1077_v9 }
 0x184   :  { %v404_v18 = vpop.f32.mrf.mxu2 }
 0x185   :  { %444 = vst [vmem:[%s1630_s4 + $0x10] sm:$0xff] %v404_v18  ;;  %v452_v20 = vsub.f32 %v404_v18, %v1057_v5  ;;  %v459_v5 = vmul.f32 %v451_v60, %v451_v60 }
 0x187   :  { %v460_v23 = vmul.f32 %v452_v20, %v452_v20 }
 0x189   :  { %v466_v24 = vadd.f32 %v460_v23, %v458_v22 }
 0x18a   :  { %v433_v3 = vpop.f32.mrf.mxu3 }
 0x18b   :  { %445 = vst [vmem:[%s1630_s4 + $0x18] sm:$0xff] %v433_v3  ;;  %v453_v8 = vsub.f32 %v433_v3, %v1062_v6 }
 0x18c   :  { %v407_v21 = vpop.f32.mrf.mxu2 }
 0x18d   :  { %446 = vst [vmem:[%s1630_s4 + $0x20] sm:$0xff] %v407_v21  ;;  %v454_v61 = vsub.f32 %v407_v21, %v1045_v2  ;;  %v461_v16 = vmul.f32 %v453_v8, %v453_v8 }
 0x18f   :  { %v462_v28 = vmul.f32 %v454_v61, %v454_v61  ;;  %v475_v29 = vadd.f32 %v461_v16, %v459_v5 }
 0x191   :  { %v467_v30 = vadd.f32 %v466_v24, %v462_v28 }
 0x192   :  { %v436_v9 = vpop.f32.mrf.mxu3 }
 0x193   :  { %447 = vst [vmem:[%s1630_s4 + $0x28] sm:$0xff] %v436_v9  ;;  %v455_v56 = vsub.f32 %v436_v9, %v1052_v4 }
 0x194   :  { %v410_v6 = vpop.f32.mrf.mxu2 }
 0x195   :  { %448 = vst [vmem:[%s1630_s4 + $0x30] sm:$0xff] %v410_v6  ;;  %v456_v27 = vsub.f32 %v410_v6, %v1035_v0  ;;  %v463_v2 = vmul.f32 %v455_v56, %v455_v56 }
 0x197   :  { %v464_v31 = vmul.f32 %v456_v27, %v456_v27  ;;  %v476_v32 = vadd.f32 %v475_v29, %v463_v2 }
 0x199   :  { %v1466_v49 = vadd.f32 %v467_v30, %v464_v31 }
 0x19a   :  { %v439_v44 = vpop.f32.mrf.mxu3 }
 0x19b   :  { %449 = vst [vmem:[%s1630_s4 + $0x38] sm:$0xff] %v439_v44  ;;  %v457_v47 = vsub.f32 %v439_v44, %v1040_v1 }
 0x19c   :  { %v512_v4 = vpop.f32.mrf.mxu2 }
 0x19d   :  { %v465_v53 = vmul.f32 %v457_v47, %v457_v47  ;;  %v577_v21 = vsub.f32 %v1176_v35, %v512_v4 }
 0x19f   :  { %v1472_v55 = vadd.f32 %v476_v32, %v465_v53 }
 0x1a2   :  { %v553_v63 = vpop.f32.mrf.mxu3 }
 0x1a3   :  { %v1489_v4 = vsub.f32 %v1176_v35, %v553_v63 }
 0x1a4   :  { %v515_v11 = vpop.f32.mrf.mxu2 }
 0x1a5   :  { %v579_v61 = vsub.f32 %v1182_v40, %v515_v11 }
 0x1aa   :  { %v556_v14 = vpop.f32.mrf.mxu3 }
 0x1ab   :  { %v1492_v53 = vsub.f32 %v1182_v40, %v556_v14 }
 0x1ac   :  { %v518_v0 = vpop.f32.mrf.mxu2 }
 0x1ad   :  { %v581_v8 = vsub.f32 %v1178_v36, %v518_v0 }
 0x1af   :  { %v593_v28 = vmin.f32 %v577_v21, %v581_v8 }
 0x1b2   :  { %v559_v15 = vpop.f32.mrf.mxu3 }
 0x1b3   :  { %v1483_v31 = vsub.f32 %v1178_v36, %v559_v15 }
 0x1b4   :  { %v521_v18 = vpop.f32.mrf.mxu2 }
 0x1b5   :  { %v583_v1 = vsub.f32 %v1184_v41, %v521_v18  ;;  %v606_v36 = vmin.f32 %v1489_v4, %v1483_v31 }
 0x1b7   :  { %v594_v29 = vmin.f32 %v579_v61, %v583_v1 }
 0x1ba   :  { %v562_v20 = vpop.f32.mrf.mxu3 }
 0x1bb   :  { %v1486_v32 = vsub.f32 %v1184_v41, %v562_v20 }
 0x1bc   :  { %v524_v22 = vpop.f32.mrf.mxu2 }
 0x1bd   :  { %v585_v5 = vsub.f32 %v1180_v37, %v524_v22  ;;  %v607_v41 = vmin.f32 %v1492_v53, %v1486_v32 }
 0x1bf   :  { %v595_v6 = vmin.f32 %v593_v28, %v585_v5 }
 0x1c2   :  { %v565_v23 = vpop.f32.mrf.mxu3 }
 0x1c3   :  { %v1495_v11 = vsub.f32 %v1180_v37, %v565_v23 }
 0x1c4   :  { %v527_v24 = vpop.f32.mrf.mxu2 }
 0x1c5   :  { %v587_v16 = vsub.f32 %v1192_v46, %v527_v24  ;;  %v608_v40 = vmin.f32 %v606_v36, %v1495_v11 }
 0x1c7   :  { %v596_v27 = vmin.f32 %v594_v29, %v587_v16 }
 0x1ca   :  { %v568_v60 = vpop.f32.mrf.mxu3 }
 0x1cb   :  { %v1498_v0 = vsub.f32 %v1192_v46, %v568_v60 }
 0x1cc   :  { %v530_v3 = vpop.f32.mrf.mxu2 }
 0x1cd   :  { %v589_v30 = vsub.f32 %v1219_v59, %v530_v3  ;;  %v609_v37 = vmin.f32 %v607_v41, %v1498_v0 }
 0x1cf   :  { %v597_v44 = vmin.f32 %v595_v6, %v589_v30 }
 0x1d2   :  { %v571_v9 = vpop.f32.mrf.mxu3 }
 0x1d3   :  { %v1505_v15 = vsub.f32 %v1219_v59, %v571_v9 }
 0x1d4   :  { %v533_v56 = vpop.f32.mrf.mxu2 }
 0x1d5   :  { %v591_v2 = vsub.f32 %v1224_v62, %v533_v56  ;;  %v610_v20 = vmin.f32 %v608_v40, %v1505_v15 }
 0x1d7   :  { %v598_v47 = vmin.f32 %v596_v27, %v591_v2 }
 0x1d9   :  { %v599_v18 = vmin.f32 %v597_v44, %v598_v47 }
 0x1da   :  { %v574_v63 = vpop.f32.mrf.mxu3 }
 0x1db   :  { %v600_v35 = vrot.slane %v599_v18, 4  ;;  %v1510_v14 = vsub.f32 %v1224_v62, %v574_v63 }
 0x1dd   :  { %v601_v46 = vmin.f32 %v599_v18, %v600_v35  ;;  %v611_v22 = vmin.f32 %v609_v37, %v1510_v14 }
 0x1df   :  { %v602_v23 = vrot.slane %v601_v46, 2  ;;  %v612_v24 = vmin.f32 %v610_v20, %v611_v22 }
 0x1e1   :  { %v603_v60 = vmin.f32 %v601_v46, %v602_v23  ;;  %v613_v3 = vrot.slane %v612_v24, 4 }
 0x1e3   :  { %v604_v59 = vrot.slane %v603_v60, 1  ;;  %v614_v28 = vmin.f32 %v612_v24, %v613_v3 }
 0x1e5   :  { %v605_v29 = vmin.f32 %v603_v60, %v604_v59  ;;  %v615_v9 = vrot.slane %v614_v28, 2 }
 0x1e7   :  { %vm619_vm0 = vcmp.eq.f32.partialorder %v577_v21, %v605_v29  ;;  %vm621_vm9 = vcmp.eq.f32.partialorder %v579_v61, %v605_v29  ;;  %vm623_vm10 = vcmp.eq.f32.partialorder %v581_v8, %v605_v29  ;;  %vm625_vm11 = vcmp.eq.f32.partialorder %v583_v1, %v605_v29 }
 0x1e8   :  { %vm627_vm12 = vcmp.eq.f32.partialorder %v585_v5, %v605_v29  ;;  %vm629_vm13 = vcmp.eq.f32.partialorder %v587_v16, %v605_v29  ;;  %v635_v62 = vsel %vm619_vm0, %v1239_v43, 64  ;;  %v637_v56 = vsel %vm621_vm9, %v1242_v7, 64 }
 0x1e9   :  { %v639_v6 = vsel %vm623_vm10, %v1245_v10, 64  ;;  %v641_v27 = vsel %vm625_vm11, %v1248_v12, 64  ;;  %vm631_vm14 = vcmp.eq.f32.partialorder %v589_v30, %v605_v29  ;;  %vm633_vm15 = vcmp.eq.f32.partialorder %v591_v2, %v605_v29 }
 0x1ea   :  { %vm651_vm1 = vcmp.lt.s32.totalorder %v635_v62, %v639_v6  ;;  %vm653_vm2 = vcmp.lt.s32.totalorder %v637_v56, %v641_v27  ;;  %v616_v44 = vmin.f32 %v614_v28, %v615_v9  ;;  %v643_v21 = vsel %vm627_vm12, %v1251_v13, 64 }
 0x1eb   :  { %v645_v8 = vsel %vm629_vm13, %v1254_v17, 64  ;;  %v652_v1 = vsel %vm651_vm1, %v635_v62, %v639_v6  ;;  %v654_v61 = vsel %vm653_vm2, %v637_v56, %v641_v27  ;;  %v647_v16 = vsel %vm631_vm14, %v1257_v25, 64 }
 0x1ec   :  { %vm655_vm4 = vcmp.lt.s32.totalorder %v652_v1, %v643_v21  ;;  %vm657_vm5 = vcmp.lt.s32.totalorder %v654_v61, %v645_v8  ;;  %v617_v5 = vrot.slane %v616_v44, 1  ;;  %v649_v47 = vsel %vm633_vm15, %v1260_v26, 64 }
 0x1ed   :  { %v656_v18 = vsel %vm655_vm4, %v652_v1, %v643_v21  ;;  %v658_v36 = vsel %vm657_vm5, %v654_v61, %v645_v8 }
 0x1ee   :  { %vm659_vm6 = vcmp.lt.s32.totalorder %v656_v18, %v647_v16  ;;  %vm661_vm7 = vcmp.lt.s32.totalorder %v658_v36, %v649_v47  ;;  %v618_v30 = vmin.f32 %v616_v44, %v617_v5 }
 0x1ef   :  { %v660_v2 = vsel %vm659_vm6, %v656_v18, %v647_v16  ;;  %v662_v41 = vsel %vm661_vm7, %v658_v36, %v649_v47  ;;  %v478_v16 = vrot.slane %v1472_v55, 4 }
 0x1f0   :  { %vm663_vm8 = vcmp.lt.s32.totalorder %v660_v2, %v662_v41  ;;  %vm620_vm0 = vcmp.eq.f32.partialorder %v1489_v4, %v618_v30  ;;  %vm622_vm9 = vcmp.eq.f32.partialorder %v1492_v53, %v618_v30  ;;  %vm624_vm10 = vcmp.eq.f32.partialorder %v1483_v31, %v618_v30 }
 0x1f1   :  { %v664_v35 = vsel %vm663_vm8, %v660_v2, %v662_v41  ;;  %vm626_vm11 = vcmp.eq.f32.partialorder %v1486_v32, %v618_v30  ;;  %vm628_vm12 = vcmp.eq.f32.partialorder %v1495_v11, %v618_v30  ;;  %v636_v40 = vsel %vm620_vm0, %v1239_v43, 64 }
 0x1f2   :  { %v665_v63 = vrot.slane %v664_v35, 4  ;;  %vm630_vm13 = vcmp.eq.f32.partialorder %v1498_v0, %v618_v30  ;;  %v638_v37 = vsel %vm622_vm9, %v1242_v7, 64  ;;  %v640_v46 = vsel %vm624_vm10, %v1245_v10, 64 }
 0x1f3   :  { %v642_v4 = vsel %vm626_vm11, %v1248_v12, 64  ;;  %vm632_vm15 = vcmp.eq.f32.partialorder %v1505_v15, %v618_v30  ;;  %vm634_vm1 = vcmp.eq.f32.partialorder %v1510_v14, %v618_v30  ;;  %v644_v32 = vsel %vm628_vm12, %v1251_v13, 64 }
 0x1f4   :  { %vm666_vm14 = vcmp.lt.s32.totalorder %v664_v35, %v665_v63  ;;  %vm674_vm2 = vcmp.lt.s32.totalorder %v636_v40, %v640_v46  ;;  %vm676_vm4 = vcmp.lt.s32.totalorder %v638_v37, %v642_v4  ;;  %v646_v11 = vsel %vm630_vm13, %v1254_v17, 64 }
 0x1f5   :  { %v667_v31 = vsel %vm666_vm14, %v664_v35, %v665_v63  ;;  %v675_v0 = vsel %vm674_vm2, %v636_v40, %v640_v46  ;;  %v677_v20 = vsel %vm676_vm4, %v638_v37, %v642_v4  ;;  %v648_v22 = vsel %vm632_vm15, %v1257_v25, 64 }
 0x1f6   :  { %v668_v53 = vrot.slane %v667_v31, 2  ;;  %vm678_vm5 = vcmp.lt.s32.totalorder %v675_v0, %v644_v32  ;;  %vm680_vm6 = vcmp.lt.s32.totalorder %v677_v20, %v646_v11  ;;  %v650_v23 = vsel %vm634_vm1, %v1260_v26, 64 }
 0x1f7   :  { %v679_v15 = vsel %vm678_vm5, %v675_v0, %v644_v32  ;;  %v681_v24 = vsel %vm680_vm6, %v677_v20, %v646_v11 }
 0x1f8   :  { %vm669_vm7 = vcmp.lt.s32.totalorder %v667_v31, %v668_v53  ;;  %vm682_vm8 = vcmp.lt.s32.totalorder %v679_v15, %v648_v22  ;;  %vm684_vm0 = vcmp.lt.s32.totalorder %v681_v24, %v650_v23 }
 0x1f9   :  { %v670_v14 = vsel %vm669_vm7, %v667_v31, %v668_v53  ;;  %v683_v3 = vsel %vm682_vm8, %v679_v15, %v648_v22  ;;  %v685_v59 = vsel %vm684_vm0, %v681_v24, %v650_v23 }
 0x1fa   :  { %v671_v60 = vrot.slane %v670_v14, 1  ;;  %vm686_vm9 = vcmp.lt.s32.totalorder %v683_v3, %v685_v59 }
 0x1fb   :  { %v687_v28 = vsel %vm686_vm9, %v683_v3, %v685_v59 }
 0x1fc   :  { %vm672_vm10 = vcmp.lt.s32.totalorder %v670_v14, %v671_v60  ;;  %v688_v9 = vrot.slane %v687_v28, 4 }
 0x1fd   :  { %v673_v29 = vsel %vm672_vm10, %v670_v14, %v671_v60 }
 0x1fe   :  { %vm711_vm11 = vcmp.eq.s32.totalorder %v1260_v26, %v673_v29  ;;  %vm689_vm12 = vcmp.lt.s32.totalorder %v687_v28, %v688_v9  ;;  %vm709_vm13 = vcmp.eq.s32.totalorder %v1257_v25, %v673_v29  ;;  %vm707_vm14 = vcmp.eq.s32.totalorder %v1254_v17, %v673_v29 }
 0x1ff   :  { %963 = vmatpush.msk.msrb.mxu0 %vm711_vm11, %v1001_v51  ;;  %v690_v62 = vsel %vm689_vm12, %v687_v28, %v688_v9  ;;  %vm705_vm1 = vcmp.eq.s32.totalorder %v1251_v13, %v673_v29  ;;  %vm703_vm2 = vcmp.eq.s32.totalorder %v1248_v12, %v673_v29  ;;  %vm701_vm5 = vcmp.eq.s32.totalorder %v1245_v10, %v673_v29 }
 0x200   :  { %v691_v56 = vrot.slane %v690_v62, 2  ;;  %vm699_vm7 = vcmp.eq.s32.totalorder %v1242_v7, %v673_v29  ;;  %vm697_vm0 = vcmp.eq.s32.totalorder %v1239_v43, %v673_v29 }
 0x201   :  { %964 = vmatpush.msk.msrb.mxu0 %vm709_vm13, %v1001_v51 }
 0x202   :  { %vm692_vm15 = vcmp.lt.s32.totalorder %v690_v62, %v691_v56 }
 0x203   :  { %965 = vmatpush.msk.msrb.mxu0 %vm707_vm14, %v1001_v51  ;;  %v693_v6 = vsel %vm692_vm15, %v690_v62, %v691_v56  ;;  %vm856_vm15 = vcmp.lt.s32.totalorder %v39_v33, 256 }
 0x204   :  { %v694_v27 = vrot.slane %v693_v6, 1 }
 0x205   :  { %966 = vmatpush.msk.msrb.mxu0 %vm705_vm1, %v1001_v51 }
 0x206   :  { %vm695_vm4 = vcmp.lt.s32.totalorder %v693_v6, %v694_v27 }
 0x207   :  { %967 = vmatpush.msk.msrb.mxu0 %vm703_vm2, %v1001_v51  ;;  %v696_v44 = vsel %vm695_vm4, %v693_v6, %v694_v27 }
 0x208   :  { %vm712_vm6 = vcmp.eq.s32.totalorder %v1260_v26, %v696_v44  ;;  %vm710_vm8 = vcmp.eq.s32.totalorder %v1257_v25, %v696_v44  ;;  %vm708_vm9 = vcmp.eq.s32.totalorder %v1254_v17, %v696_v44  ;;  %vm706_vm10 = vcmp.eq.s32.totalorder %v1251_v13, %v696_v44 }
 0x209   :  { %968 = vmatpush.msk.msrb.mxu0 %vm701_vm5, %v1001_v51  ;;  %975 = vmatpush.msk.msrb.mxu1 %vm712_vm6, %v1001_v51  ;;  %vm704_vm11 = vcmp.eq.s32.totalorder %v1248_v12, %v696_v44  ;;  %vm702_vm12 = vcmp.eq.s32.totalorder %v1245_v10, %v696_v44  ;;  %vm700_vm13 = vcmp.eq.s32.totalorder %v1242_v7, %v696_v44 }
 0x20a   :  { %vm698_vm14 = vcmp.eq.s32.totalorder %v1239_v43, %v696_v44 }
 0x20b   :  { %969 = vmatpush.msk.msrb.mxu0 %vm699_vm7, %v1001_v51  ;;  %976 = vmatpush.msk.msrb.mxu1 %vm710_vm8, %v1001_v51 }
 0x20d   :  { %970 = vmatpush.msk.msrb.mxu0 %vm697_vm0, %v1001_v51  ;;  %977 = vmatpush.msk.msrb.mxu1 %vm708_vm9, %v1001_v51 }
 0x20e   :  { %971 = vmatmul.msk.f32.vlgmr.msrb.gmra.mxu0 %vm371_vm3, %v1314_v19 }
 0x20f   :  { %978 = vmatpush.msk.msrb.mxu1 %vm706_vm10, %v1001_v51 }
 0x211   :  { %979 = vmatpush.msk.msrb.mxu1 %vm704_vm11, %v1001_v51 }
 0x213   :  { %980 = vmatpush.msk.msrb.mxu1 %vm702_vm12, %v1001_v51 }
 0x215   :  { %981 = vmatpush.msk.msrb.mxu1 %vm700_vm13, %v1001_v51 }
 0x216   :  { %972 = vmatmul.msk.f32.gmra.mxu0 %vm371_vm3, %v1353_v45 }
 0x217   :  { %982 = vmatpush.msk.msrb.mxu1 %vm698_vm14, %v1001_v51 }
 0x218   :  { %983 = vmatmul.msk.f32.vlgmr.msrb.gmra.mxu1 %vm371_vm3, %v1314_v19 }
 0x21e   :  { %973 = vmatmul.msk.f32.gmra.mxu0 %vm371_vm3, %v1388_v57 }
 0x220   :  { %984 = vmatmul.msk.f32.gmra.mxu1 %vm371_vm3, %v1353_v45 }
 0x226   :  { %974 = vmatmul.msk.f32.gmra.mxu0 %vm371_vm3, %v1398_v58 }
 0x228   :  { %985 = vmatmul.msk.f32.gmra.mxu1 %vm371_vm3, %v1388_v57 }
 0x230   :  { %986 = vmatmul.msk.f32.gmra.mxu1 %vm371_vm3, %v1398_v58  ;;  %vm851_vm3 = vcmask 1040384  }
 0x28b   :  { %v762_v43 = vpop.f32.mrf.mxu0 }
 0x28c   :  { %987 = vst [vmem:[%s1630_s4 + $0x40] sm:$0xff] %v762_v43  ;;  %v812_v17 = vsub.f32 %v762_v43, %v1347_v38 }
 0x28e   :  { %v820_v19 = vmul.f32 %v812_v17, %v812_v17 }
 0x293   :  { %v765_v7 = vpop.f32.mrf.mxu0 }
 0x294   :  { %989 = vst [vmem:[%s1630_s4 + $0x50] sm:$0xff] %v765_v7  ;;  %v814_v13 = vsub.f32 %v765_v7, %v1339_v54 }
 0x295   :  { %v791_v10 = vpop.f32.mrf.mxu1 }
 0x296   :  { %988 = vst [vmem:[%s1630_s4 + $0x48] sm:$0xff] %v791_v10  ;;  %v822_v51 = vmul.f32 %v814_v13, %v814_v13  ;;  %v813_v61 = vsub.f32 %v791_v10, %v1382_v42 }
 0x298   :  { %v828_v58 = vadd.f32 %v822_v51, %v820_v19  ;;  %v821_v36 = vmul.f32 %v813_v61, %v813_v61 }
 0x29b   :  { %v768_v12 = vpop.f32.mrf.mxu0 }
 0x29c   :  { %991 = vst [vmem:[%s1630_s4 + $0x60] sm:$0xff] %v768_v12  ;;  %v816_v26 = vsub.f32 %v768_v12, %v1331_v34 }
 0x29d   :  { %v794_v25 = vpop.f32.mrf.mxu1 }
 0x29e   :  { %990 = vst [vmem:[%s1630_s4 + $0x58] sm:$0xff] %v794_v25  ;;  %v824_v45 = vmul.f32 %v816_v26, %v816_v26  ;;  %v815_v34 = vsub.f32 %v794_v25, %v1376_v39  ;;  %v479_v39 = vadd.f32 %v478_v16, %v1472_v55 }
 0x2a0   :  { %v829_v21 = vadd.f32 %v828_v58, %v824_v45  ;;  %v823_v47 = vmul.f32 %v815_v34, %v815_v34  ;;  %v480_v37 = vrot.slane %v479_v39, 2 }
 0x2a2   :  { %v837_v41 = vadd.f32 %v823_v47, %v821_v36  ;;  %v481_v53 = vadd.f32 %v480_v37, %v479_v39 }
 0x2a3   :  { %v771_v57 = vpop.f32.mrf.mxu0 }
 0x2a4   :  { %993 = vst [vmem:[%s1630_s4 + $0x70] sm:$0xff] %v771_v57  ;;  %v818_v54 = vsub.f32 %v771_v57, %v1323_v50  ;;  %v469_v50 = vrot.slane %v1466_v49, 4  ;;  %v482_v22 = vrot.slane %v481_v53, 1 }
 0x2a5   :  { %v797_v38 = vpop.f32.mrf.mxu1 }
 0x2a6   :  { %v826_v8 = vmul.f32 %v818_v54, %v818_v54  ;;  %992 = vst [vmem:[%s1630_s4 + $0x68] sm:$0xff] %v797_v38  ;;  %v817_v5 = vsub.f32 %v797_v38, %v1367_v52  ;;  %v470_v52 = vadd.f32 %v469_v50, %v1466_v49 }
 0x2a8   :  { %v830_v1 = vadd.f32 %v829_v21, %v826_v8  ;;  %v825_v30 = vmul.f32 %v817_v5, %v817_v5  ;;  %v471_v31 = vrot.slane %v470_v52, 2 }
 0x2aa   :  { %v831_v18 = vrot.slane %v830_v1, 4  ;;  %v838_v63 = vadd.f32 %v837_v41, %v825_v30  ;;  %v472_v0 = vadd.f32 %v471_v31, %v470_v52 }
 0x2ac   :  { %v832_v35 = vadd.f32 %v831_v18, %v830_v1  ;;  %v473_v24 = vrot.slane %v472_v0, 1 }
 0x2ad   :  { %v800_v2 = vpop.f32.mrf.mxu1 }
 0x2ae   :  { %994 = vst [vmem:[%s1630_s4 + $0x78] sm:$0xff] %v800_v2  ;;  %v819_v42 = vsub.f32 %v800_v2, %v1358_v48  ;;  %v833_v46 = vrot.slane %v832_v35, 2  ;;  %v483_v48 = vadd.f32 %v482_v22, %v481_v53  ;;  %v474_v3 = vadd.f32 %v473_v24, %v472_v0 }
 0x2b0   :  { %v827_v40 = vmul.f32 %v819_v42, %v819_v42  ;;  %v834_v11 = vadd.f32 %v833_v46, %v832_v35 }
 0x2b2   :  { %v839_v4 = vadd.f32 %v838_v63, %v827_v40  ;;  %v835_v23 = vrot.slane %v834_v11, 1 }
 0x2b4   :  { %v840_v32 = vrot.slane %v839_v4, 4  ;;  %v836_v60 = vadd.f32 %v835_v23, %v834_v11 }
 0x2b6   :  { %v841_v55 = vadd.f32 %v840_v32, %v839_v4  ;;  %v846_v28 = vadd.f32 %v836_v60, %v474_v3 }
 0x2b8   :  { %v842_v20 = vrot.slane %v841_v55, 2 }
 0x2ba   :  { %v843_v15 = vadd.f32 %v842_v20, %v841_v55 }
 0x2bc   :  { %v844_v14 = vrot.slane %v843_v15, 1 }
 0x2be   :  { %v845_v49 = vadd.f32 %v844_v14, %v843_v15 }
 0x2c0   :  { %v847_v59 = vadd.f32 %v845_v49, %v483_v48 }
 0x2c2   :  { %v850_v29 = vrot.slane %v847_v59, 7 }
 0x2c4   :  { %v852_v9 = vsel %vm851_vm3, %v846_v28, %v850_v29 }
 0x2c5   :  { %858 = vst.msk [vmem:[%s1631_s5] sm:$0x3] %vm856_vm15, %v852_v9 }

</bundles_post_ra>
